<compile_context>
chip_gen: v7x
topology: tpu7x:2x2x1
jax: 0.10.0
libtpu: 0.0.40
codegen_flags: <defaults>
</compile_context>

<pallas_src>
import functools

import jax
import jax.numpy as jnp
from jax.experimental import pallas as pl
from jax.experimental.pallas import tpu as pltpu


HIDDEN = 1024   # fixed by the module (self.input_shape = 1024)
N_OUT = 10
N_LAYERS = 7


# -----------------------------------------------------------------------------
# Fused Pallas kernel: one grid step == one layer.
#   x_ref : (B, K)     f32   network input (resident; consumed at layer 0 only)
#   w_ref : (K, N)     int8  this layer's masked + 4-bit-quantized weight (streamed)
#   b_ref : (L, 1, N)  f32   resident bias stack   (indexed by program_id)
#   s_ref : (L, 1, N)  f32   resident per-layer weight scale (broadcast over N)
#   o_ref : (B, N)     f32   resident activation buffer across layers / final output
# -----------------------------------------------------------------------------
def _fused_mlp_kernel(x_ref, w_ref, b_ref, s_ref, o_ref, *, act_qmax):
    layer = pl.program_id(0)
    n_layers = pl.num_programs(0)

    # Layer 0: 4-bit symmetric fake-quant of the input (brevitas QuantIdentity),
    # done in-kernel so the quantized input never round-trips through HBM.
    @pl.when(layer == 0)
    def _():
        x = x_ref[...]
        amax = jnp.max(jnp.abs(x), axis=1, keepdims=True)     # (B, 1)
        amax = jnp.max(amax, axis=0, keepdims=True)           # (1, 1)
        amax = jnp.maximum(amax, 1e-8)
        s = amax / act_qmax
        q = jnp.clip(jnp.round(x / s), -act_qmax - 1.0, act_qmax)
        o_ref[...] = q * s

    # int8 weight codes lie in [-7, 7] -> bf16 cast is exact; the per-layer f32
    # scale is applied to the small (B, N) matmul result, not the weight tile.
    h = o_ref[...].astype(jnp.bfloat16)
    w = w_ref[...].astype(jnp.bfloat16)
    acc = jnp.dot(h, w, preferred_element_type=jnp.float32)
    y = acc * s_ref[layer] + b_ref[layer]

    @pl.when(layer < n_layers - 1)          # act1..act6: ReLU (f32)
    def _():
        o_ref[...] = jnp.maximum(y, 0.0)

    @pl.when(layer == n_layers - 1)         # fc7: logits, no activation
    def _():
        o_ref[...] = y


def fused_masked_mlp(x, w_stack, b_stack, s_stack, *, precision=4):
    """x:(B,K) f32, w_stack:(L,K,N) int8, b_stack/s_stack:(L,1,N) f32 -> (B,N) f32."""
    B, K = x.shape
    L, K2, N = w_stack.shape
    assert K2 == K and b_stack.shape == (L, 1, N) and s_stack.shape == (L, 1, N)
    act_qmax = float(2 ** (precision - 1) - 1)
    kernel = functools.partial(_fused_mlp_kernel, act_qmax=act_qmax)
    return pl.pallas_call(
        kernel,
        out_shape=jax.ShapeDtypeStruct((B, N), jnp.float32),
        grid_spec=pltpu.PrefetchScalarGridSpec(
            num_scalar_prefetch=0,
            grid=(L,),
            in_specs=[
                pl.BlockSpec((B, K), lambda l: (0, 0)),           # input (resident)
                pl.BlockSpec((None, K, N), lambda l: (l, 0, 0)),  # int8 weight (streamed)
                pl.BlockSpec((L, 1, N), lambda l: (0, 0, 0)),     # bias stack (resident)
                pl.BlockSpec((L, 1, N), lambda l: (0, 0, 0)),     # scale stack (resident)
            ],
            out_specs=pl.BlockSpec((B, N), lambda l: (0, 0)),     # resident activations
        ),
        compiler_params=pltpu.CompilerParams(
            dimension_semantics=("arbitrary",),   # layer axis is a sequential chain
            vmem_limit_bytes=32 << 20,
        ),
    )(x, w_stack, b_stack, s_stack)


# -----------------------------------------------------------------------------
# One-time weight preparation: mask -> 4-bit quant codes (int8 storage) + f32 scale,
# transpose to (K, N), zero-pad fc7 to 1024 outputs so the layer grid is uniform.
# Cached; NOT part of the per-forward hot path.
# -----------------------------------------------------------------------------
def prepare_fused_params(params, masks, precision=4):
    qmax = 2.0 ** (precision - 1) - 1.0      # narrow symmetric range [-qmax, qmax]
    w_list, b_list, s_list = [], [], []
    for i in range(1, N_LAYERS + 1):
        w, b = params[f"fc{i}"]              # w: (out, in), b: (out,)
        m = masks[f"fc{i}"]
        wm = w * m
        scale = jnp.maximum(jnp.max(jnp.abs(wm)), 1e-8) / qmax
        q = jnp.clip(jnp.round(wm / scale), -qmax, qmax)     # quant codes, (out, in)
        qt = q.T.astype(jnp.int8)                            # (in, out) int8 storage
        if qt.shape[1] < HIDDEN:                             # pad fc7 (10 -> 1024 outputs)
            qt = jnp.pad(qt, ((0, 0), (0, HIDDEN - qt.shape[1])))
            b = jnp.pad(b, (0, HIDDEN - b.shape[0]))
        w_list.append(qt)
        b_list.append(b.reshape(1, HIDDEN).astype(jnp.float32))
        s_list.append(jnp.full((1, HIDDEN), scale, jnp.float32))
    w_stack = jnp.stack(w_list)    # (7, 1024, 1024) int8  (~7 MiB total)
    b_stack = jnp.stack(b_list)    # (7, 1, 1024)    f32
    s_stack = jnp.stack(s_list)    # (7, 1, 1024)    f32
    return w_stack, b_stack, s_stack


# -----------------------------------------------------------------------------
# Forward pass (hot path is just the fused Pallas kernel + logit slice)
# -----------------------------------------------------------------------------
@functools.partial(jax.jit, static_argnames=("precision",))
def model_bv_masked_forward(x, w_stack, b_stack, s_stack, precision=4):
    out_full = fused_masked_mlp(x, w_stack, b_stack, s_stack, precision=precision)
    return out_full[:, :N_OUT]


# Pure-JAX reference (same int8-code / bf16-matmul / f32-scale math) for sanity check.
def _reference_forward(x, w_stack, b_stack, s_stack, precision=4):
    qmax = 2.0 ** (precision - 1) - 1.0
    amax = jnp.maximum(jnp.max(jnp.abs(x)), 1e-8)
    s = amax / qmax
    h = jnp.clip(jnp.round(x / s), -qmax - 1.0, qmax) * s
    L = w_stack.shape[0]
    for l in range(L):
        acc = jnp.dot(h.astype(jnp.bfloat16), w_stack[l].astype(jnp.bfloat16),
                      preferred_element_type=jnp.float32)
        y = acc * s_stack[l] + b_stack[l]
        h = jnp.maximum(y, 0.0) if l < L - 1 else y
    return h[:, :N_OUT]


# -----------------------------------------------------------------------------
# Deterministic parameter / mask construction
# -----------------------------------------------------------------------------
def build_params_and_masks(key, hidden=HIDDEN, n_out=N_OUT):
    dims = [(hidden, hidden)] * 6 + [(n_out, hidden)]    # (out, in) per layer
    params, masks = {}, {}
    for i, (dout, din) in enumerate(dims, start=1):
        key, kw, kb, km = jax.random.split(key, 4)
        w = jax.random.normal(kw, (dout, din), jnp.float32) * (1.0 / jnp.sqrt(din))
        b = jax.random.normal(kb, (dout,), jnp.float32) * 0.01
        m = jax.random.bernoulli(km, p=0.25, shape=(dout, din)).astype(jnp.float32)
        params[f"fc{i}"] = (w, b)
        masks[f"fc{i}"] = m
    return params, masks


if __name__ == "__main__":
    key = jax.random.PRNGKey(0)
    key, kx = jax.random.split(key)

    batch = 8   # B is a free throughput lever: weight-stream cost is independent of B
    params, masks = build_params_and_masks(key, hidden=HIDDEN, n_out=N_OUT)
    x = jax.random.normal(kx, (batch, HIDDEN), jnp.float32)

    # One-time weight prep (cached; not part of the per-forward hot path).
    w_stack, b_stack, s_stack = jax.block_until_ready(
        prepare_fused_params(params, masks, precision=4))

    out = model_bv_masked_forward(x, w_stack, b_stack, s_stack, precision=4)
    out = jax.block_until_ready(out)
    assert out.shape == (batch, N_OUT) and out.dtype == jnp.float32
    assert bool(jnp.all(jnp.isfinite(out)))

    ref = jax.block_until_ready(
        _reference_forward(x, w_stack, b_stack, s_stack, precision=4))
    assert bool(jnp.allclose(out, ref, rtol=2e-2, atol=1e-3))

    print("KERNEL_OK")
</pallas_src>

<mosaic_0001>
module attributes {stable_mosaic.version = 11 : i64} {
  func.func @_fused_mlp_kernel(%arg0: i32, %arg1: memref<8x1024xf32, #tpu.memory_space<vmem>>, %arg2: memref<1x1024x1024xi8, #tpu.memory_space<vmem>>, %arg3: memref<7x1x1024xf32, #tpu.memory_space<vmem>>, %arg4: memref<7x1x1024xf32, #tpu.memory_space<vmem>>, %arg5: memref<8x1024xf32, #tpu.memory_space<vmem>>) attributes {dimension_semantics = [#tpu.dimension_semantics<arbitrary>], iteration_bounds = array<i64: 7>, scalar_prefetch = 0 : i64, scratch_operands = 0 : i64, tpu.core_type = #tpu.core_type<tc>, window_params = [{pipeline_mode = #tpu.pipeline_mode<synchronous>, transform_indices = @transform_0, window_bounds = array<i64: 8, 1024>}, {transform_indices = @transform_1, window_bounds = array<i64: 1, 1024, 1024>}, {pipeline_mode = #tpu.pipeline_mode<synchronous>, transform_indices = @transform_2, window_bounds = array<i64: 7, 1, 1024>}, {pipeline_mode = #tpu.pipeline_mode<synchronous>, transform_indices = @transform_3, window_bounds = array<i64: 7, 1, 1024>}, {pipeline_mode = #tpu.pipeline_mode<synchronous>, transform_indices = @transform_4, window_bounds = array<i64: 8, 1024>}]} {
    %c0_i32 = arith.constant 0 : i32
    %0 = arith.cmpi eq, %arg0, %c0_i32 : i32
    %1 = arith.extui %0 : i1 to i32
    %c0_i32_0 = arith.constant 0 : i32
    %2 = arith.cmpi ne, %1, %c0_i32_0 : i32
    scf.if %2 {
      %c0_12 = arith.constant 0 : index
      %c0_13 = arith.constant 0 : index
      %25 = vector.load %arg1[%c0_12, %c0_13] : memref<8x1024xf32, #tpu.memory_space<vmem>>, vector<8x1024xf32>
      %26 = math.absf %25 : vector<8x1024xf32>
      %cst_14 = arith.constant dense<0xFF800000> : vector<8xf32>
      %27 = vector.multi_reduction <maximumf>, %26, %cst_14 [1] : vector<8x1024xf32> to vector<8xf32>
      %28 = vector.shape_cast %27 : vector<8xf32> to vector<8x1xf32>
      %cst_15 = arith.constant dense<0xFF800000> : vector<1xf32>
      %29 = vector.multi_reduction <maximumf>, %28, %cst_15 [0] : vector<8x1xf32> to vector<1xf32>
      %30 = vector.shape_cast %29 : vector<1xf32> to vector<1x1xf32>
      %cst_16 = arith.constant 9.99999993E-9 : f32
      %31 = vector.broadcast %cst_16 : f32 to vector<1x1xf32>
      %32 = arith.maximumf %30, %31 : vector<1x1xf32>
      %cst_17 = arith.constant 7.000000e+00 : f32
      %33 = vector.broadcast %cst_17 : f32 to vector<1x1xf32>
      %34 = arith.divf %32, %33 : vector<1x1xf32>
      %35 = vector.broadcast %34 : vector<1x1xf32> to vector<8x1024xf32>
      %36 = arith.divf %25, %35 : vector<8x1024xf32>
      %37 = math.roundeven %36 : vector<8x1024xf32>
      %cst_18 = arith.constant -8.000000e+00 : f32
      %cst_19 = arith.constant 7.000000e+00 : f32
      %38 = vector.broadcast %cst_18 : f32 to vector<8x1024xf32>
      %39 = arith.maximumf %38, %37 : vector<8x1024xf32>
      %40 = vector.broadcast %cst_19 : f32 to vector<8x1024xf32>
      %41 = arith.minimumf %40, %39 : vector<8x1024xf32>
      %42 = vector.broadcast %34 : vector<1x1xf32> to vector<8x1024xf32>
      %43 = arith.mulf %41, %42 : vector<8x1024xf32>
      %c0_20 = arith.constant 0 : index
      %c0_21 = arith.constant 0 : index
      %44 = vector.load %arg5[%c0_20, %c0_21] : memref<8x1024xf32, #tpu.memory_space<vmem>>, vector<8x1024xf32>
      tpu.vector_store %arg5[%c0_20, %c0_21], %43 {strides = array<i32>} : memref<8x1024xf32, #tpu.memory_space<vmem>>, vector<8x1024xf32>,
    } else {
    }
    %c0 = arith.constant 0 : index
    %c0_1 = arith.constant 0 : index
    %3 = vector.load %arg5[%c0, %c0_1] : memref<8x1024xf32, #tpu.memory_space<vmem>>, vector<8x1024xf32>
    %4 = arith.truncf %3 : vector<8x1024xf32> to vector<8x1024xbf16>
    %c0_2 = arith.constant 0 : index
    %c0_3 = arith.constant 0 : index
    %c0_4 = arith.constant 0 : index
    %5 = vector.load %arg2[%c0_2, %c0_3, %c0_4] : memref<1x1024x1024xi8, #tpu.memory_space<vmem>>, vector<1x1024x1024xi8>
    %6 = vector.shape_cast %5 : vector<1x1024x1024xi8> to vector<1024x1024xi8>
    %7 = arith.sitofp %6 : vector<1024x1024xi8> to vector<1024x1024xbf16>
    %cst = arith.constant dense<0.000000e+00> : vector<8x1024xf32>
    %8 = tpu.matmul %4, %7, %cst {dimension_numbers = #tpu.dot_dimension_numbers<[1], [0], [0], [1], [0, 0, 1, 1], [], []>} : vector<8x1024xbf16>, vector<1024x1024xbf16>, vector<8x1024xf32> -> vector<8x1024xf32>
    %9 = arith.index_cast %arg0 : i32 to index
    %c0_5 = arith.constant 0 : index
    %c0_6 = arith.constant 0 : index
    %10 = vector.load %arg4[%9, %c0_5, %c0_6] : memref<7x1x1024xf32, #tpu.memory_space<vmem>>, vector<1x1x1024xf32>
    %11 = vector.shape_cast %10 : vector<1x1x1024xf32> to vector<1x1024xf32>
    %12 = vector.broadcast %11 : vector<1x1024xf32> to vector<8x1024xf32>
    %13 = arith.mulf %8, %12 : vector<8x1024xf32>
    %14 = arith.index_cast %arg0 : i32 to index
    %c0_7 = arith.constant 0 : index
    %c0_8 = arith.constant 0 : index
    %15 = vector.load %arg3[%14, %c0_7, %c0_8] : memref<7x1x1024xf32, #tpu.memory_space<vmem>>, vector<1x1x1024xf32>
    %16 = vector.shape_cast %15 : vector<1x1x1024xf32> to vector<1x1024xf32>
    %17 = vector.broadcast %16 : vector<1x1024xf32> to vector<8x1024xf32>
    %18 = arith.addf %13, %17 : vector<8x1024xf32>
    %c6_i32 = arith.constant 6 : i32
    %19 = arith.cmpi slt, %arg0, %c6_i32 : i32
    %20 = arith.extui %19 : i1 to i32
    %c0_i32_9 = arith.constant 0 : i32
    %21 = arith.cmpi ne, %20, %c0_i32_9 : i32
    scf.if %21 {
      %cst_12 = arith.constant 0.000000e+00 : f32
      %25 = vector.broadcast %cst_12 : f32 to vector<8x1024xf32>
      %26 = arith.maximumf %18, %25 : vector<8x1024xf32>
      %c0_13 = arith.constant 0 : index
      %c0_14 = arith.constant 0 : index
      %27 = vector.load %arg5[%c0_13, %c0_14] : memref<8x1024xf32, #tpu.memory_space<vmem>>, vector<8x1024xf32>
      tpu.vector_store %arg5[%c0_13, %c0_14], %26 {strides = array<i32>} : memref<8x1024xf32, #tpu.memory_space<vmem>>, vector<8x1024xf32>,
    } else {
    }
    %c6_i32_10 = arith.constant 6 : i32
    %22 = arith.cmpi eq, %arg0, %c6_i32_10 : i32
    %23 = arith.extui %22 : i1 to i32
    %c0_i32_11 = arith.constant 0 : i32
    %24 = arith.cmpi ne, %23, %c0_i32_11 : i32
    scf.if %24 {
      %c0_12 = arith.constant 0 : index
      %c0_13 = arith.constant 0 : index
      %25 = vector.load %arg5[%c0_12, %c0_13] : memref<8x1024xf32, #tpu.memory_space<vmem>>, vector<8x1024xf32>
      tpu.vector_store %arg5[%c0_12, %c0_13], %18 {strides = array<i32>} : memref<8x1024xf32, #tpu.memory_space<vmem>>, vector<8x1024xf32>,
    } else {
    }
    return
  }
  func.func @transform_0(%arg0: i32) -> (i32, i32) {
    %c0_i32 = arith.constant 0 : i32
    %c0_i32_0 = arith.constant 0 : i32
    %c0_i32_1 = arith.constant 0 : i32
    return %c0_i32, %c0_i32_0 : i32, i32
  }
  func.func @transform_1(%arg0: i32) -> (i32, i32, i32) {
    %c0_i32 = arith.constant 0 : i32
    %c0_i32_0 = arith.constant 0 : i32
    %c0_i32_1 = arith.constant 0 : i32
    return %arg0, %c0_i32, %c0_i32_0 : i32, i32, i32
  }
  func.func @transform_2(%arg0: i32) -> (i32, i32, i32) {
    %c0_i32 = arith.constant 0 : i32
    %c0_i32_0 = arith.constant 0 : i32
    %c0_i32_1 = arith.constant 0 : i32
    %c0_i32_2 = arith.constant 0 : i32
    return %c0_i32, %c0_i32_0, %c0_i32_1 : i32, i32, i32
  }
  func.func @transform_3(%arg0: i32) -> (i32, i32, i32) {
    %c0_i32 = arith.constant 0 : i32
    %c0_i32_0 = arith.constant 0 : i32
    %c0_i32_1 = arith.constant 0 : i32
    %c0_i32_2 = arith.constant 0 : i32
    return %c0_i32, %c0_i32_0, %c0_i32_1 : i32, i32, i32
  }
  func.func @transform_4(%arg0: i32) -> (i32, i32) {
    %c0_i32 = arith.constant 0 : i32
    %c0_i32_0 = arith.constant 0 : i32
    %c0_i32_1 = arith.constant 0 : i32
    return %c0_i32, %c0_i32_0 : i32, i32
  }
}

</mosaic_0001>

<bundles_post_ra>
// kernel: model_bv_masked_forward.1
= control target key start
LH: loop header
LB: loop body
LE: loop exit
PB: predicated region body
PF: predicated region fallthrough
CT: control target
= control target key end

     0   :  { %9 = vsyncpa [#allocation3], 0  ;;  %s2991_s0 = inlined_call_operand.hbm [shape: f32[8,1024], index: 0, kind: input, shape index: {}]   ;;  %s2992_s1 = inlined_call_operand.hbm [shape: s8[7,1024,1024], index: 1, kind: input, shape index: {}]   ;;  %s2993_s2 = inlined_call_operand.hbm [shape: f32[7,1,1024], index: 2, kind: input, shape index: {}]   ;;  %s2994_s3 = inlined_call_operand.hbm [shape: f32[7,1,1024], index: 3, kind: input, shape index: {}]   ;;  %s2995_s4 = inlined_call_operand.vmem [shape: f32[8,1024], index: 4, kind: output, shape index: {}]  }
   0x1   :  { %10 = vsyncpa [#allocation5], 0 }
   0x2   :  { %12 = vsyncpa [#allocation5 + $0x1], 0 }
   0x3   :  { %13 = vsyncpa [#allocation8], 0  ;;  %s2334_s15 = smov 0   ;;  %s2336_s16 = smov 0  }
   0x4   :  { %s2338_s17 = smov 0   ;;  %s2340_s18 = smov 0  }
   0x5 LB: > { %s2353_s19 = sadd.s32 4294967295, %s2299_s18   ;;  %s2356_s20 = sadd.s32 1, %s2299_s18   ;;  %s2299_s18 = sphi %s2340_s18, %s3021_s18   ;;  %s2295_s17 = sphi %s2338_s17, %s3020_s17   ;;  %s2291_s16 = sphi %s2336_s16, %s3019_s16   ;;  %s2287_s15 = sphi %s2334_s15, %s3018_s15  }
   0x6   : > { %s44_s21 = ssub.s32 %s2299_s18, %s2356_s20  ;;  %s47_s22 = sadd.s32 1, %s2295_s17 }
   0x7   : > { %p45_p0 = scmp.eq.s32.totalorder %s44_s21, 0  ;;  %p54_p1 = scmp.ne.s32.totalorder %s2295_s17, %s2291_s16 }
   0x8   : > { %p55_p2 = scmp.eq.s32.totalorder %s2299_s18, 0  ;;  %p60_p3 = scmp.ne.s32.totalorder %s2291_s16, %s2287_s15 }
   0x9   : > { %s2366_s23 = scalar_select %p45_p0, %s2295_s17, %s47_s22  }
   0xa   : > { %p2368_p4 = por %p55_p2, %p54_p1  ;;  %p2996_p5 = scmp.eq.s32.totalorder %s2353_s19, 0 }
   0xb   : > { %3000 = sst [smem:[#allocation13_spill]] %s2366_s23  ;;  %p1982_p6 = scmp.ge.s32.totalorder %s2299_s18, 1 }
   0xc   : > { %p134_p7 = scmp.lt.s32.totalorder %s2299_s18, 8  ;;  %p2377_p8 = por %p2996_p5, %p60_p3 }
   0xd   : > { %s2301_s27 = smov [#allocation6]   ;;  %p2089_p13 = scmp.lt.s32.totalorder %s2299_s18, 7 }
   0xe   : > { %s3002_s25 = scalar_select %p2377_p8, 1, 0 }
   0xf   : > { %p2382_p10 = pnand %p1982_p6, %p134_p7  ;;  %s157_s28 = sshll.u32 %s2301_s27, 4  ;;  %s158_s28 = int_to_ptr.vmem [resolvable:$true] %s157_s28 }
  0x10   : > { %p2397_p0 = pnand %p2089_p13, %p2368_p4  ;;  %s2134_s7 = scalar_lea.hbm %s2993_s2, 896 }
  0x11   : > { %s3003_s26 = scalar_select %p2382_p10, 1, 0 }
  0x12   : > { %p2072_p11 = pneg %p2382_p10  ;;  %p2135_p1 = scmp.ne.s32.totalorder %s2993_s2, %s2134_s7 }
  0x13   : > { %s3005_s30 = scalar_select %p2397_p0, 1, 0 }
  0x14   : > { %p2390_p12 = pnand %p2072_p11, %p2996_p5  ;;  %p2141_p6 = scmp.lt.u32.totalorder %s2134_s7, %s2993_s2 }
  0x16   : > { %p2409_p2 = pneg %p2390_p12 }
  0x18   : > { %p2137_p3 = pnand %p2409_p2, %p2135_p1 }
  0x1a   : > { %p2138_p4 = pneg %p2137_p3 }
  0x1c   : > { %p2143_p7 = pnand %p2141_p6, %p2138_p4 }
  0x1e   : > { %2146 = shalt.err (!%p2143_p7)
}
  0x1f   : > { %s2147_s13 = scalar_lea.vmem %s158_s28, 896  ;;  %p2155_p5 = scmp.lt.s32.totalorder %s158_s28, %s158_s28 }
  0x20   : > { %p2148_p11 = scmp.ne.s32.totalorder %s158_s28, %s2147_s13  ;;  %p2156_p8 = scmp.lt.s32.totalorder %s2147_s13, %s2147_s13 }
  0x22   : > { %p2150_p13 = pnand %p2148_p11, %p2409_p2  ;;  %p2157_p10 = por %p2156_p8, %p2155_p5 }
  0x24   : > { %p2151_p9 = pneg %p2150_p13 }
  0x26   : > { %p2158_p0 = pnand %p2157_p10, %p2151_p9 }
  0x28   : > { %2161 = shalt.err (!%p2158_p0)
}
  0x29   : > { %s2302_s14 = smov 128   ;;  %s2303_s15 = smov 8  }
  0x2a   : > { %2078 = dma.hbm_to_vmem [thread:$0]  (!%p2390_p12), %s2993_s2, 896, %s158_s28, [#allocation5], %s2302_s14, %s2302_s14, %s2303_s15  }
  0x2b   : > { %s2304_s24 = smov [#allocation2]   ;;  %s2305_s5 = smov [#allocation7]  }
  0x2c   : > { %s147_s27 = sshll.u32 %s2304_s24, 4  ;;  %s170_s6 = sshll.u32 %s2305_s5, 4  ;;  %s148_s27 = int_to_ptr.vmem [resolvable:$true] %s147_s27  ;;  %s171_s6 = int_to_ptr.vmem [resolvable:$true] %s170_s6 }
  0x2d   : > { %s2162_s9 = scalar_lea.hbm %s2991_s0, 1024 }
  0x2e   : > { %p2163_p5 = scmp.ne.s32.totalorder %s2991_s0, %s2162_s9  ;;  %p2169_p10 = scmp.lt.u32.totalorder %s2162_s9, %s2991_s0 }
  0x30   : > { %p2165_p8 = pnand %p2163_p5, %p2409_p2 }
  0x32   : > { %p2166_p9 = pneg %p2165_p8 }
  0x34   : > { %p2171_p0 = pnand %p2169_p10, %p2166_p9 }
  0x36   : > { %2174 = shalt.err (!%p2171_p0)
}
  0x37   : > { %s2175_s28 = scalar_lea.vmem %s148_s27, 1024  ;;  %p2183_p6 = scmp.lt.s32.totalorder %s148_s27, %s148_s27 }
  0x38   : > { %p2176_p1 = scmp.ne.s32.totalorder %s148_s27, %s2175_s28  ;;  %p2184_p7 = scmp.lt.s32.totalorder %s2175_s28, %s2175_s28 }
  0x3a   : > { %p2178_p3 = pnand %p2176_p1, %p2409_p2  ;;  %p2185_p11 = por %p2184_p7, %p2183_p6 }
  0x3c   : > { %p2179_p4 = pneg %p2178_p3 }
  0x3e   : > { %p2186_p13 = pnand %p2185_p11, %p2179_p4 }
  0x40   : > { %2189 = shalt.err (!%p2186_p13)
}
  0x41   : > { %2075 = dma.hbm_to_vmem [thread:$0]  (!%p2390_p12), %s2991_s0, 1024, %s148_s27, [#allocation3]  }
  0x42   : > { %s184_s23 = sand.u32 1, %s2299_s18   ;;  %s2190_s7 = scalar_lea.hbm %s2994_s3, 896 }
  0x43   : > { %p2191_p5 = scmp.ne.s32.totalorder %s2994_s3, %s2190_s7  ;;  %p2197_p10 = scmp.lt.u32.totalorder %s2190_s7, %s2994_s3 }
  0x45   : > { %p2193_p8 = pnand %p2191_p5, %p2409_p2 }
  0x47   : > { %p2194_p9 = pneg %p2193_p8 }
  0x49   : > { %p2199_p0 = pnand %p2197_p10, %p2194_p9 }
  0x4b   : > { %2202 = shalt.err (!%p2199_p0)
}
  0x4c   : > { %s2203_s27 = scalar_lea.vmem %s171_s6, 896  ;;  %p2211_p6 = scmp.lt.s32.totalorder %s171_s6, %s171_s6 }
  0x4d   : > { %p2204_p1 = scmp.ne.s32.totalorder %s171_s6, %s2203_s27  ;;  %p2212_p7 = scmp.lt.s32.totalorder %s2203_s27, %s2203_s27 }
  0x4f   : > { %p2206_p3 = pnand %p2204_p1, %p2409_p2  ;;  %p2213_p11 = por %p2212_p7, %p2211_p6 }
  0x51   : > { %p2207_p4 = pneg %p2206_p3 }
  0x53   : > { %p2214_p13 = pnand %p2213_p11, %p2207_p4 }
  0x55   : > { %2217 = shalt.err (!%p2214_p13)
}
  0x56   : > { %2081 = dma.hbm_to_vmem [thread:$0]  (!%p2390_p12), %s2994_s3, 896, %s171_s6, [#allocation8], %s2302_s14, %s2302_s14, %s2303_s15  }
  0x57   : > { %s186_s10 = sand.u32 1, %s2295_s17   ;;  %s2001_s22 = sshll.u32 %s2299_s18, 15 }
  0x58   : > { %s1987_s21 = sshll.u32 %s186_s10, 11  ;;  %s2473_s7 = scalar_lea.hbm %s2992_s1, %s2001_s22 }
  0x59   : > { %s188_s29 = scalar_lea.vmem [#allocation4], %s1987_s21  ;;  %s2477_s9 = scalar_lea.sflag [#allocation5], %s184_s23 }
  0x5a   : > { %s195_s8 = sshll.u32 %s188_s29, 4  ;;  %s2218_s11 = scalar_lea.hbm %s2473_s7, 32768  ;;  %s2475_s8 = int_to_ptr.vmem [resolvable:$true] %s195_s8 }
  0x5b   : > { %p2219_p12 = scmp.ne.s32.totalorder %s2473_s7, %s2218_s11  ;;  %p3007_p2 = scmp.ne.s32.totalorder %s3005_s30, 0 }
  0x5c   : > { %s2223_s15 = scalar_lea.hbm %s2992_s1, 229376  ;;  %p2224_p10 = scmp.lt.u32.totalorder %s2473_s7, %s2992_s1 }
  0x5d   : > { %p2220_p5 = pneg %p3007_p2  ;;  %p2225_p0 = scmp.lt.u32.totalorder %s2223_s15, %s2218_s11 }
  0x5e   : > { %p2227_p3 = scmp.lt.u32.totalorder %s2218_s11, %s2473_s7 }
  0x5f   : > { %p2221_p8 = pnand %p2220_p5, %p2219_p12  ;;  %p2226_p1 = por %p2225_p0, %p2224_p10 }
  0x61   : > { %p2222_p9 = pneg %p2221_p8  ;;  %p2228_p4 = por %p2227_p3, %p2226_p1 }
  0x63   : > { %p2229_p6 = pnand %p2228_p4, %p2222_p9 }
  0x65   : > { %2232 = shalt.err (!%p2229_p6)
}
  0x66   : > { %s2233_s23 = scalar_lea.vmem %s2475_s8, 32768  ;;  %s2306_s27 = smov [#allocation4]  }
  0x67   : > { %p2234_p7 = scmp.ne.s32.totalorder %s2475_s8, %s2233_s23  ;;  %s2238_s13 = sshll.u32 %s2306_s27, 4  ;;  %s2239_s13 = int_to_ptr.vmem [resolvable:$false] %s2238_s13 }
  0x68   : > { %s2240_s28 = scalar_lea.vmem %s2239_s13, 65536  ;;  %p2241_p12 = scmp.lt.s32.totalorder %s2475_s8, %s2239_s13 }
  0x69   : > { %p2236_p11 = pnand %p2234_p7, %p2220_p5  ;;  %p2242_p8 = scmp.lt.s32.totalorder %s2240_s28, %s2233_s23 }
  0x6b   : > { %p2237_p13 = pneg %p2236_p11  ;;  %p2243_p10 = por %p2242_p8, %p2241_p12 }
  0x6d   : > { %p2244_p0 = pnand %p2243_p10, %p2237_p13 }
  0x6f   : > { %2247 = shalt.err (!%p2244_p0)
}
  0x70   : > { %s2307_s10 = smov 1024   ;;  %s2308_s21 = smov 64  }
  0x71   : > { %2085 = dma.hbm_to_vmem [thread:$0]  (!%p3007_p2), %s2473_s7, 32768, %s2475_s8, %s2477_s9, %s2307_s10, %s2307_s10, %s2308_s21  }
  0x72   : > { %p3008_p5 = scmp.ne.s32.totalorder %s3003_s26, 0 }
  0x73   : > { %p3009_p9 = scmp.eq.s32.totalorder (!%p3008_p5), %s2353_s19, 0 }
  0x74   : > { %207 = sbr.rel (%p3008_p5) target bundleno = 1075 (0x433), region = 36 }
  0x7b   : > { %2265 = dma.done.wait (%p3009_p9), [#allocation3], 1024   ;;  %p3010_p1 = pmov %p3009_p9 }
  0x7c   : > { %s213_s22 = sand.u32 1, %s2353_s19   ;;  %s215_s24 = sand.u32 1, %s2291_s16  }
  0x7d   : > { %2267 = vsyncadd (%p3010_p1), [#allocation3], 4294966272  ;;  %s1992_s5 = sshll.u32 %s215_s24, 11  ;;  %s214_s29 = scalar_lea.sflag [#allocation5], %s213_s22 }
  0x7e   : > { %s2513_s11 = scalar_lea.vmem [#allocation4], %s1992_s5  ;;  %p3011_p3 = scmp.ne.s32.totalorder %s3002_s25, 0 }
  0x80   : > { %2269 = dma.done.wait (%p3011_p3), %s214_s29, 32768  }
  0x81   : > { %2271 = vsyncadd (%p3011_p3), %s214_s29, 4294934528  ;;  %p3012_p2 = pmov %p3010_p1 }
  0x82   : > { %p3013_p4 = pmov %p3010_p1 }
  0x83   : > { %2273 = dma.done.wait (%p3012_p2), [#allocation5], 896  }
  0x84   : > { %2275 = vsyncadd (%p3013_p4), [#allocation5], 4294966400  ;;  %p3014_p6 = pmov %p3010_p1 }
  0x85   : > { %p3015_p7 = pmov %p3010_p1 }
  0x86   : > { %2277 = dma.done.wait (%p3014_p6), [#allocation8], 896  }
  0x87   : > { %2279 = vsyncadd (%p3015_p7), [#allocation8], 4294966400  ;;  %p3016_p11 = scmp.ne.s32.totalorder %s2353_s19, 0 }
  0x88   : > { %v249_v0 = vld [vmem:[#allocation2] sm:$0xff] (!%p3016_p11)  ;;  %v250_v1 = vld [vmem:[#allocation2 + $0x8] sm:$0xff] (!%p3016_p11)  ;;  %v251_v2 = vld [vmem:[#allocation2 + $0x10] sm:$0xff] (!%p3016_p11) }
  0x89   : > { %248 = sbr.rel (%p3016_p11) target bundleno = 331 (0x14b), region = 56  ;;  %v252_v3 = vld [vmem:[#allocation2 + $0x18] sm:$0xff] (!%p3016_p11)  ;;  %v253_v4 = vld [vmem:[#allocation2 + $0x20] sm:$0xff] (!%p3016_p11)  ;;  %v254_v5 = vld [vmem:[#allocation2 + $0x28] sm:$0xff] (!%p3016_p11) }
  0x8a   : > { %v255_v6 = vld [vmem:[#allocation2 + $0x30] sm:$0xff] (!%p3016_p11)  ;;  %v256_v7 = vld [vmem:[#allocation2 + $0x38] sm:$0xff] (!%p3016_p11)  ;;  %2280 = vmaxabs.init.f32.vacc0 (!%p3016_p11), %v249_v0, %v253_v4 }
  0x8c   : > { %2281 = vmaxabs.f32.vacc0 (!%p3016_p11), %v250_v1, %v254_v5 }
  0x8e   : > { %2282 = vmaxabs.f32.vacc0 (!%p3016_p11), %v251_v2, %v255_v6 }
  0x90   : > { %2283 = vmaxabs.f32.vacc0 %v252_v3, %v256_v7 }
  0x92   : > { %v2284_v8 = vmovacc.low.even.vacc0 }
  0x94   : > { %272 = vmax.xlane.f32.xlu0 %v2284_v8 }
 0x121   : > { %v273_v9 = vpop.xlane.xlu0 %272 }
 0x122   : > { %v274_v10 = vrot.slane %v273_v9, 4 }
 0x124   : > { %v275_v11 = vmax.f32 %v273_v9, %v274_v10 }
 0x126   : > { %v276_v12 = vrot.slane %v275_v11, 2 }
 0x128   : > { %v277_v13 = vmax.f32 %v275_v11, %v276_v12 }
 0x12a   : > { %v278_v14 = vrot.slane %v277_v13, 1 }
 0x12c   : > { %v279_v15 = vmax.f32 %v277_v13, %v278_v14 }
 0x12e   : > { %v280_v16 = vmax.f32 %v279_v15, 1e-08 }
 0x130   : > { %v282_v17 = vmul.f32 0.14285715, %v280_v16 }
 0x132   : > { %2132 = vrcp.f32 %v282_v17 }
 0x13c   : > { %v2133_v18 = vpop.eup %2132 }
 0x13d   : > { %v284_v19 = vmul.f32 %v2133_v18, %v249_v0  ;;  %v285_v20 = vmul.f32 %v2133_v18, %v250_v1  ;;  %v286_v21 = vmul.f32 %v2133_v18, %v251_v2  ;;  %v287_v22 = vmul.f32 %v2133_v18, %v252_v3 }
 0x13e   : > { %v288_v23 = vmul.f32 %v2133_v18, %v253_v4  ;;  %v289_v24 = vmul.f32 %v2133_v18, %v254_v5  ;;  %v290_v25 = vmul.f32 %v2133_v18, %v255_v6  ;;  %v291_v26 = vmul.f32 %v2133_v18, %v256_v7 }
 0x13f   : > { %v2050_v27 = vround.rtne.f32 %v284_v19  ;;  %v2051_v28 = vround.rtne.f32 %v285_v20  ;;  %v2052_v29 = vround.rtne.f32 %v286_v21  ;;  %v2053_v30 = vround.rtne.f32 %v287_v22 }
 0x140   : > { %v2054_v31 = vround.rtne.f32 %v288_v23  ;;  %v2055_v32 = vround.rtne.f32 %v289_v24  ;;  %v2056_v33 = vround.rtne.f32 %v290_v25  ;;  %v2057_v34 = vround.rtne.f32 %v291_v26 }
 0x141   : > { %v300_v35 = vmax.f32 %v2050_v27, -8.0  ;;  %v301_v36 = vmax.f32 %v2051_v28, -8.0  ;;  %v302_v37 = vmax.f32 %v2052_v29, -8.0  ;;  %v303_v38 = vmax.f32 %v2053_v30, -8.0 }
 0x142   : > { %v304_v39 = vmax.f32 %v2054_v31, -8.0  ;;  %v305_v40 = vmax.f32 %v2055_v32, -8.0  ;;  %v306_v41 = vmax.f32 %v2056_v33, -8.0  ;;  %v307_v42 = vmax.f32 %v2057_v34, -8.0 }
 0x143   : > { %v308_v43 = vmin.f32 %v300_v35, 7.0  ;;  %v309_v44 = vmin.f32 %v301_v36, 7.0  ;;  %v310_v45 = vmin.f32 %v302_v37, 7.0  ;;  %v311_v46 = vmin.f32 %v303_v38, 7.0 }
 0x144   : > { %v312_v47 = vmin.f32 %v304_v39, 7.0  ;;  %v313_v48 = vmin.f32 %v305_v40, 7.0  ;;  %v314_v49 = vmin.f32 %v306_v41, 7.0  ;;  %v315_v50 = vmin.f32 %v307_v42, 7.0 }
 0x145   : > { %v316_v51 = vmul.f32 %v308_v43, %v282_v17  ;;  %v317_v52 = vmul.f32 %v309_v44, %v282_v17  ;;  %v318_v53 = vmul.f32 %v310_v45, %v282_v17  ;;  %v319_v54 = vmul.f32 %v311_v46, %v282_v17 }
 0x146   : > { %v320_v55 = vmul.f32 %v312_v47, %v282_v17  ;;  %v321_v56 = vmul.f32 %v313_v48, %v282_v17  ;;  %v322_v57 = vmul.f32 %v314_v49, %v282_v17  ;;  %v323_v58 = vmul.f32 %v315_v50, %v282_v17 }
 0x147   : > { %324 = vst [vmem:[%s2995_s4] sm:$0xff] %v316_v51  ;;  %325 = vst [vmem:[%s2995_s4 + $0x8] sm:$0xff] %v317_v52 }
 0x148   : > { %326 = vst [vmem:[%s2995_s4 + $0x10] sm:$0xff] %v318_v53  ;;  %327 = vst [vmem:[%s2995_s4 + $0x18] sm:$0xff] %v319_v54 }
 0x149   : > { %328 = vst [vmem:[%s2995_s4 + $0x20] sm:$0xff] %v320_v55  ;;  %329 = vst [vmem:[%s2995_s4 + $0x28] sm:$0xff] %v321_v56 }
 0x14a   : > { %330 = vst [vmem:[%s2995_s4 + $0x30] sm:$0xff] %v322_v57  ;;  %331 = vst [vmem:[%s2995_s4 + $0x38] sm:$0xff] %v323_v58 }
 0x14b PF: > { %v349_v59 = vld [vmem:[%s2513_s11 + $0x8] sm:$0xff]  ;;  %v351_v60 = vld [vmem:[%s2513_s11 + $0x18] sm:$0xff]  ;;  %v348_v61 = vld [vmem:[%s2513_s11] sm:$0xff]  ;;  %s1996_s23 = sshll.u32 %s2353_s19, 3  ;;  %p1997_p13 = scmp.ge.s32.totalorder %s2353_s19, 6 }
 0x14c   : > { %v605_v62 = vunpack.c.l.s8.bf16 %v349_v59  ;;  %v613_v63 = vunpack.c.h.s8.bf16 %v349_v59  ;;  %v607_v0 = vunpack.c.l.s8.bf16 %v351_v60  ;;  %v615_v1 = vunpack.c.h.s8.bf16 %v351_v60  ;;  %v350_v2 = vld [vmem:[%s2513_s11 + $0x10] sm:$0xff]  ;;  %v357_v5 = vld [vmem:[%s2513_s11 + $0x48] sm:$0xff]  ;;  %v359_v6 = vld [vmem:[%s2513_s11 + $0x58] sm:$0xff]  ;;  %s1773_s27 = scalar_lea.vmem [#allocation7], %s1996_s23  ;;  %s1824_s13 = scalar_lea.vmem [#allocation6], %s1996_s23 }
 0x14d   : > { %v604_v3 = vunpack.c.l.s8.bf16 %v348_v61  ;;  %v606_v4 = vunpack.c.l.s8.bf16 %v350_v2  ;;  %v612_v7 = vunpack.c.h.s8.bf16 %v348_v61  ;;  %v614_v8 = vunpack.c.h.s8.bf16 %v350_v2  ;;  %v356_v11 = vld [vmem:[%s2513_s11 + $0x40] sm:$0xff]  ;;  %v358_v12 = vld [vmem:[%s2513_s11 + $0x50] sm:$0xff]  ;;  %v365_v17 = vld [vmem:[%s2513_s11 + $0x88] sm:$0xff] }
 0x14e   : > { %1116 = vmatprep.subr.bf16.mxu0 %v605_v62  ;;  %1280 = vmatprep.subr.bf16.mxu1 %v607_v0  ;;  %v621_v9 = vunpack.c.l.s8.bf16 %v357_v5  ;;  %v623_v10 = vunpack.c.l.s8.bf16 %v359_v6  ;;  %v620_v13 = vunpack.c.l.s8.bf16 %v356_v11  ;;  %v622_v14 = vunpack.c.l.s8.bf16 %v358_v12  ;;  %v367_v18 = vld [vmem:[%s2513_s11 + $0x98] sm:$0xff]  ;;  %v364_v23 = vld [vmem:[%s2513_s11 + $0x80] sm:$0xff]  ;;  %v366_v24 = vld [vmem:[%s2513_s11 + $0x90] sm:$0xff] }
 0x14f   : > { %1117 = vmatpush1.bf16.msra.mxu0 %v604_v3  ;;  %1281 = vmatpush1.bf16.msra.mxu1 %v606_v4  ;;  %v629_v15 = vunpack.c.h.s8.bf16 %v357_v5  ;;  %v631_v16 = vunpack.c.h.s8.bf16 %v359_v6  ;;  %v628_v19 = vunpack.c.h.s8.bf16 %v356_v11  ;;  %v630_v20 = vunpack.c.h.s8.bf16 %v358_v12  ;;  %v333_v25 = vld [vmem:[%s2995_s4 + $0x8] sm:$0xff]  ;;  %v375_v32 = vld [vmem:[%s2513_s11 + $0xd8] sm:$0xff]  ;;  %v372_v37 = vld [vmem:[%s2513_s11 + $0xc0] sm:$0xff] }
 0x150   : > { %1118 = vmatprep.subr.bf16.mxu0 %v613_v63  ;;  %1282 = vmatprep.subr.bf16.mxu1 %v615_v1  ;;  %v637_v21 = vunpack.c.l.s8.bf16 %v365_v17  ;;  %v639_v22 = vunpack.c.l.s8.bf16 %v367_v18  ;;  %v636_v26 = vunpack.c.l.s8.bf16 %v364_v23  ;;  %v638_v27 = vunpack.c.l.s8.bf16 %v366_v24  ;;  %v373_v31 = vld [vmem:[%s2513_s11 + $0xc8] sm:$0xff]  ;;  %v374_v38 = vld [vmem:[%s2513_s11 + $0xd0] sm:$0xff]  ;;  %v383_v44 = vld [vmem:[%s2513_s11 + $0x118] sm:$0xff] }
 0x151   : > { %v645_v28 = vunpack.c.h.s8.bf16 %v365_v17  ;;  %v647_v29 = vunpack.c.h.s8.bf16 %v367_v18  ;;  %v2568_v30 = vpack.c.bf16 %v333_v25, %v333_v25  ;;  %v644_v33 = vunpack.c.h.s8.bf16 %v364_v23  ;;  %v381_v43 = vld [vmem:[%s2513_s11 + $0x108] sm:$0xff]  ;;  %v380_v49 = vld [vmem:[%s2513_s11 + $0x100] sm:$0xff]  ;;  %v382_v50 = vld [vmem:[%s2513_s11 + $0x110] sm:$0xff] }
 0x152   : > { %v646_v34 = vunpack.c.h.s8.bf16 %v366_v24  ;;  %v653_v35 = vunpack.c.l.s8.bf16 %v373_v31  ;;  %v655_v36 = vunpack.c.l.s8.bf16 %v375_v32  ;;  %v652_v39 = vunpack.c.l.s8.bf16 %v372_v37  ;;  %v389_v55 = vld [vmem:[%s2513_s11 + $0x148] sm:$0xff]  ;;  %v391_v56 = vld [vmem:[%s2513_s11 + $0x158] sm:$0xff]  ;;  %v388_v61 = vld [vmem:[%s2513_s11 + $0x140] sm:$0xff] }
 0x153   : > { %1119 = vmatpush1.bf16.msra.mxu0 %v612_v7  ;;  %1283 = vmatpush1.bf16.msra.mxu1 %v614_v8  ;;  %v654_v40 = vunpack.c.l.s8.bf16 %v374_v38  ;;  %v661_v41 = vunpack.c.h.s8.bf16 %v373_v31  ;;  %v663_v42 = vunpack.c.h.s8.bf16 %v375_v32  ;;  %v660_v45 = vunpack.c.h.s8.bf16 %v372_v37  ;;  %v390_v62 = vld [vmem:[%s2513_s11 + $0x150] sm:$0xff]  ;;  %v397_v3 = vld [vmem:[%s2513_s11 + $0x188] sm:$0xff]  ;;  %v399_v4 = vld [vmem:[%s2513_s11 + $0x198] sm:$0xff] }
 0x154   : > { %1120 = vmatprep.subr.bf16.mxu0 %v621_v9  ;;  %1284 = vmatprep.subr.bf16.mxu1 %v623_v10  ;;  %v662_v46 = vunpack.c.h.s8.bf16 %v374_v38  ;;  %v669_v47 = vunpack.c.l.s8.bf16 %v381_v43  ;;  %v671_v48 = vunpack.c.l.s8.bf16 %v383_v44  ;;  %v668_v51 = vunpack.c.l.s8.bf16 %v380_v49  ;;  %v396_v9 = vld [vmem:[%s2513_s11 + $0x180] sm:$0xff]  ;;  %v398_v10 = vld [vmem:[%s2513_s11 + $0x190] sm:$0xff]  ;;  %v335_v38 = vld [vmem:[%s2995_s4 + $0x18] sm:$0xff] }
 0x155   : > { %1148 = vmatprep.mubr.bf16.mxu0 %v2568_v30  ;;  %1312 = vmatprep.mubr.bf16.mxu1 %v2568_v30  ;;  %v670_v52 = vunpack.c.l.s8.bf16 %v382_v50  ;;  %v677_v53 = vunpack.c.h.s8.bf16 %v381_v43  ;;  %v679_v54 = vunpack.c.h.s8.bf16 %v383_v44  ;;  %v676_v57 = vunpack.c.h.s8.bf16 %v380_v49  ;;  %v332_v32 = vld [vmem:[%s2995_s4] sm:$0xff]  ;;  %v421_v43 = vld [vmem:[%s2513_s11 + $0x248] sm:$0xff]  ;;  %v423_v44 = vld [vmem:[%s2513_s11 + $0x258] sm:$0xff] }
 0x156   : > { %v678_v58 = vunpack.c.h.s8.bf16 %v382_v50  ;;  %v685_v59 = vunpack.c.l.s8.bf16 %v389_v55  ;;  %v687_v60 = vunpack.c.l.s8.bf16 %v391_v56  ;;  %v684_v63 = vunpack.c.l.s8.bf16 %v388_v61  ;;  %v420_v50 = vld [vmem:[%s2513_s11 + $0x240] sm:$0xff] }
 0x157   : > { %1121 = vmatpush1.bf16.msra.mxu0 %v620_v13  ;;  %1285 = vmatpush1.bf16.msra.mxu1 %v622_v14  ;;  %v686_v0 = vunpack.c.l.s8.bf16 %v390_v62  ;;  %v693_v1 = vunpack.c.h.s8.bf16 %v389_v55  ;;  %v695_v2 = vunpack.c.h.s8.bf16 %v391_v56  ;;  %v692_v5 = vunpack.c.h.s8.bf16 %v388_v61  ;;  %v429_v56 = vld [vmem:[%s2513_s11 + $0x288] sm:$0xff] }
 0x158   : > { %1122 = vmatprep.subr.bf16.mxu0 %v629_v15  ;;  %1286 = vmatprep.subr.bf16.mxu1 %v631_v16  ;;  %v694_v6 = vunpack.c.h.s8.bf16 %v390_v62  ;;  %v701_v7 = vunpack.c.l.s8.bf16 %v397_v3  ;;  %v703_v8 = vunpack.c.l.s8.bf16 %v399_v4  ;;  %v700_v11 = vunpack.c.l.s8.bf16 %v396_v9  ;;  %v405_v15 = vld [vmem:[%s2513_s11 + $0x1c8] sm:$0xff]  ;;  %v407_v16 = vld [vmem:[%s2513_s11 + $0x1d8] sm:$0xff]  ;;  %v428_v62 = vld [vmem:[%s2513_s11 + $0x280] sm:$0xff] }
 0x159   : > { %v702_v12 = vunpack.c.l.s8.bf16 %v398_v10  ;;  %v709_v13 = vunpack.c.h.s8.bf16 %v397_v3  ;;  %v711_v14 = vunpack.c.h.s8.bf16 %v399_v4  ;;  %v708_v17 = vunpack.c.h.s8.bf16 %v396_v9  ;;  %v437_v4 = vld [vmem:[%s2513_s11 + $0x2c8] sm:$0xff] }
 0x15a   : > { %v710_v18 = vunpack.c.h.s8.bf16 %v398_v10  ;;  %v725_v25 = vunpack.c.h.s8.bf16 %v405_v15  ;;  %v2599_v37 = vpack.c.bf16 %v332_v32, %v332_v32  ;;  %v751_v49 = vunpack.c.l.s8.bf16 %v423_v44  ;;  %v436_v10 = vld [vmem:[%s2513_s11 + $0x2c0] sm:$0xff] }
 0x15b   : > { %1123 = vmatpush1.bf16.msra.mxu0 %v628_v19  ;;  %1287 = vmatpush1.bf16.msra.mxu1 %v630_v20  ;;  %v717_v19 = vunpack.c.l.s8.bf16 %v405_v15  ;;  %v719_v20 = vunpack.c.l.s8.bf16 %v407_v16  ;;  %v759_v55 = vunpack.c.h.s8.bf16 %v423_v44 }
 0x15c   : > { %1124 = vmatprep.subr.bf16.mxu0 %v637_v21  ;;  %1288 = vmatprep.subr.bf16.mxu1 %v639_v22  ;;  %v404_v21 = vld [vmem:[%s2513_s11 + $0x1c0] sm:$0xff]  ;;  %v406_v22 = vld [vmem:[%s2513_s11 + $0x1d0] sm:$0xff] }
 0x15d   : > { %v716_v23 = vunpack.c.l.s8.bf16 %v404_v21  ;;  %v718_v24 = vunpack.c.l.s8.bf16 %v406_v22  ;;  %v726_v31 = vunpack.c.h.s8.bf16 %v406_v22  ;;  %v444_v22 = vld [vmem:[%s2513_s11 + $0x300] sm:$0xff] }
 0x15f   : > { %1125 = vmatpush1.bf16.msra.mxu0 %v636_v26  ;;  %1289 = vmatpush1.bf16.msra.mxu1 %v638_v27  ;;  %v727_v26 = vunpack.c.h.s8.bf16 %v407_v16  ;;  %v413_v27 = vld [vmem:[%s2513_s11 + $0x208] sm:$0xff] }
 0x160   : > { %1126 = vmatprep.subr.bf16.mxu0 %v645_v28  ;;  %1290 = vmatprep.subr.bf16.mxu1 %v647_v29  ;;  %v415_v28 = vld [vmem:[%s2513_s11 + $0x218] sm:$0xff]  ;;  %v724_v29 = vunpack.c.h.s8.bf16 %v404_v21  ;;  %v445_v16 = vld [vmem:[%s2513_s11 + $0x308] sm:$0xff] }
 0x163   : > { %1127 = vmatpush1.bf16.msra.mxu0 %v644_v33  ;;  %1291 = vmatpush1.bf16.msra.mxu1 %v646_v34  ;;  %v733_v33 = vunpack.c.l.s8.bf16 %v413_v27  ;;  %v735_v34 = vunpack.c.l.s8.bf16 %v415_v28 }
 0x164   : > { %1128 = vmatprep.subr.bf16.mxu0 %v653_v35  ;;  %1292 = vmatprep.subr.bf16.mxu1 %v655_v36  ;;  %v412_v35 = vld [vmem:[%s2513_s11 + $0x200] sm:$0xff]  ;;  %v414_v36 = vld [vmem:[%s2513_s11 + $0x210] sm:$0xff] }
 0x167   : > { %1129 = vmatpush1.bf16.msra.mxu0 %v652_v39  ;;  %1293 = vmatpush1.bf16.msra.mxu1 %v654_v40  ;;  %v732_v39 = vunpack.c.l.s8.bf16 %v412_v35  ;;  %v734_v40 = vunpack.c.l.s8.bf16 %v414_v36 }
 0x168   : > { %1130 = vmatprep.subr.bf16.mxu0 %v661_v41  ;;  %1294 = vmatprep.subr.bf16.mxu1 %v663_v42  ;;  %v741_v41 = vunpack.c.h.s8.bf16 %v413_v27  ;;  %v743_v42 = vunpack.c.h.s8.bf16 %v415_v28  ;;  %v453_v28 = vld [vmem:[%s2513_s11 + $0x348] sm:$0xff] }
 0x16b   : > { %1131 = vmatpush1.bf16.msra.mxu0 %v660_v45  ;;  %1295 = vmatpush1.bf16.msra.mxu1 %v662_v46  ;;  %v2606_v45 = vpack.c.bf16 %v335_v38, %v335_v38  ;;  %v740_v46 = vunpack.c.h.s8.bf16 %v412_v35  ;;  %v452_v35 = vld [vmem:[%s2513_s11 + $0x340] sm:$0xff] }
 0x16c   : > { %1132 = vmatprep.subr.bf16.mxu0 %v669_v47  ;;  %1296 = vmatprep.subr.bf16.mxu1 %v671_v48  ;;  %v742_v47 = vunpack.c.h.s8.bf16 %v414_v36  ;;  %v749_v48 = vunpack.c.l.s8.bf16 %v421_v43  ;;  %v454_v36 = vld [vmem:[%s2513_s11 + $0x350] sm:$0xff]  ;;  %v812_v38 = vunpack.c.l.s8.bf16 %v452_v35  ;;  %v820_v44 = vunpack.c.h.s8.bf16 %v452_v35 }
 0x16f   : > { %1133 = vmatpush1.bf16.msra.mxu0 %v668_v51  ;;  %1297 = vmatpush1.bf16.msra.mxu1 %v670_v52  ;;  %v422_v51 = vld [vmem:[%s2513_s11 + $0x250] sm:$0xff]  ;;  %v748_v52 = vunpack.c.l.s8.bf16 %v420_v50 }
 0x170   : > { %1134 = vmatprep.subr.bf16.mxu0 %v677_v53  ;;  %1298 = vmatprep.subr.bf16.mxu1 %v679_v54  ;;  %v750_v53 = vunpack.c.l.s8.bf16 %v422_v51  ;;  %v757_v54 = vunpack.c.h.s8.bf16 %v421_v43  ;;  %v463_v43 = vld [vmem:[%s2513_s11 + $0x398] sm:$0xff] }
 0x173   : > { %1135 = vmatpush1.bf16.msra.mxu0 %v676_v57  ;;  %1299 = vmatpush1.bf16.msra.mxu1 %v678_v58  ;;  %v431_v57 = vld [vmem:[%s2513_s11 + $0x298] sm:$0xff]  ;;  %v756_v58 = vunpack.c.h.s8.bf16 %v420_v50  ;;  %v462_v50 = vld [vmem:[%s2513_s11 + $0x390] sm:$0xff] }
 0x174   : > { %1136 = vmatprep.subr.bf16.mxu0 %v685_v59  ;;  %1300 = vmatprep.subr.bf16.mxu1 %v687_v60  ;;  %v758_v59 = vunpack.c.h.s8.bf16 %v422_v51  ;;  %v765_v60 = vunpack.c.l.s8.bf16 %v429_v56  ;;  %v767_v61 = vunpack.c.l.s8.bf16 %v431_v57  ;;  %v775_v3 = vunpack.c.h.s8.bf16 %v431_v57 }
 0x177   : > { %1137 = vmatpush1.bf16.msra.mxu0 %v684_v63  ;;  %1301 = vmatpush1.bf16.msra.mxu1 %v686_v0  ;;  %v430_v63 = vld [vmem:[%s2513_s11 + $0x290] sm:$0xff]  ;;  %v764_v0 = vunpack.c.l.s8.bf16 %v428_v62 }
 0x178   : > { %1138 = vmatprep.subr.bf16.mxu0 %v693_v1  ;;  %1302 = vmatprep.subr.bf16.mxu1 %v695_v2  ;;  %v766_v1 = vunpack.c.l.s8.bf16 %v430_v63  ;;  %v773_v2 = vunpack.c.h.s8.bf16 %v429_v56  ;;  %v471_v56 = vld [vmem:[%s2513_s11 + $0x3d8] sm:$0xff] }
 0x17b   : > { %1139 = vmatpush1.bf16.msra.mxu0 %v692_v5  ;;  %1303 = vmatpush1.bf16.msra.mxu1 %v694_v6  ;;  %v439_v5 = vld [vmem:[%s2513_s11 + $0x2d8] sm:$0xff]  ;;  %v772_v6 = vunpack.c.h.s8.bf16 %v428_v62  ;;  %v470_v62 = vld [vmem:[%s2513_s11 + $0x3d0] sm:$0xff] }
 0x17c   : > { %1140 = vmatprep.subr.bf16.mxu0 %v701_v7  ;;  %1304 = vmatprep.subr.bf16.mxu1 %v703_v8  ;;  %v774_v7 = vunpack.c.h.s8.bf16 %v430_v63  ;;  %v781_v8 = vunpack.c.l.s8.bf16 %v437_v4  ;;  %v783_v9 = vunpack.c.l.s8.bf16 %v439_v5  ;;  %v791_v15 = vunpack.c.h.s8.bf16 %v439_v5 }
 0x17f   : > { %1141 = vmatpush1.bf16.msra.mxu0 %v700_v11  ;;  %1305 = vmatpush1.bf16.msra.mxu1 %v702_v12  ;;  %v438_v11 = vld [vmem:[%s2513_s11 + $0x2d0] sm:$0xff]  ;;  %v780_v12 = vunpack.c.l.s8.bf16 %v436_v10 }
 0x180   : > { %1142 = vmatprep.subr.bf16.mxu0 %v709_v13  ;;  %1306 = vmatprep.subr.bf16.mxu1 %v711_v14  ;;  %v782_v13 = vunpack.c.l.s8.bf16 %v438_v11  ;;  %v789_v14 = vunpack.c.h.s8.bf16 %v437_v4  ;;  %v479_v4 = vld [vmem:[%s2513_s11 + $0x418] sm:$0xff] }
 0x183   : > { %1143 = vmatpush1.bf16.msra.mxu0 %v708_v17  ;;  %1307 = vmatpush1.bf16.msra.mxu1 %v710_v18  ;;  %v447_v17 = vld [vmem:[%s2513_s11 + $0x318] sm:$0xff]  ;;  %v788_v18 = vunpack.c.h.s8.bf16 %v436_v10  ;;  %v476_v10 = vld [vmem:[%s2513_s11 + $0x400] sm:$0xff] }
 0x184   : > { %1144 = vmatprep.subr.bf16.mxu0 %v717_v19  ;;  %1308 = vmatprep.subr.bf16.mxu1 %v719_v20  ;;  %v790_v19 = vunpack.c.h.s8.bf16 %v438_v11  ;;  %v797_v20 = vunpack.c.l.s8.bf16 %v445_v16  ;;  %v799_v21 = vunpack.c.l.s8.bf16 %v447_v17  ;;  %v807_v27 = vunpack.c.h.s8.bf16 %v447_v17  ;;  %v478_v11 = vld [vmem:[%s2513_s11 + $0x410] sm:$0xff] }
 0x185   : > { %v871_v17 = vunpack.c.h.s8.bf16 %v479_v4 }
 0x187   : > { %1145 = vmatpush1.bf16.msra.mxu0 %v716_v23  ;;  %1309 = vmatpush1.bf16.msra.mxu1 %v718_v24  ;;  %v446_v23 = vld [vmem:[%s2513_s11 + $0x310] sm:$0xff]  ;;  %v796_v24 = vunpack.c.l.s8.bf16 %v444_v22 }
 0x188   : > { %1146 = vmatprep.subr.bf16.mxu0 %v725_v25  ;;  %1310 = vmatprep.subr.bf16.mxu1 %v727_v26  ;;  %v798_v25 = vunpack.c.l.s8.bf16 %v446_v23  ;;  %v805_v26 = vunpack.c.h.s8.bf16 %v445_v16  ;;  %v806_v32 = vunpack.c.h.s8.bf16 %v446_v23 }
 0x18b   : > { %1147 = vmatpush1.bf16.msra.mxu0 %v724_v29  ;;  %1311 = vmatpush1.bf16.msra.mxu1 %v726_v31  ;;  %v455_v29 = vld [vmem:[%s2513_s11 + $0x358] sm:$0xff]  ;;  %v804_v31 = vunpack.c.h.s8.bf16 %v444_v22  ;;  %v870_v22 = vunpack.c.h.s8.bf16 %v478_v11 }
 0x18c   : > { %1157 = vmatprep.subr.bf16.mxu0 %v733_v33  ;;  %1321 = vmatprep.subr.bf16.mxu1 %v735_v34  ;;  %v813_v33 = vunpack.c.l.s8.bf16 %v453_v28  ;;  %v815_v34 = vunpack.c.l.s8.bf16 %v455_v29 }
 0x18e   : > { %1149 = vmatmul.mubr.bf16.vlgmr.msra.gmra.mrb[0].mxu0 %v2599_v37  ;;  %1313 = vmatmul.mubr.bf16.vlgmr.msra.gmra.mrb[0].mxu1 %v2599_v37 }
 0x18f   : > { %1158 = vmatpush1.bf16.msra.mxu0 %v732_v39  ;;  %1322 = vmatpush1.bf16.msra.mxu1 %v734_v40  ;;  %v814_v39 = vunpack.c.l.s8.bf16 %v454_v36  ;;  %v821_v40 = vunpack.c.h.s8.bf16 %v453_v28 }
 0x190   : > { %1159 = vmatprep.subr.bf16.mxu0 %v741_v41  ;;  %1323 = vmatprep.subr.bf16.mxu1 %v743_v42  ;;  %v823_v41 = vunpack.c.h.s8.bf16 %v455_v29  ;;  %v461_v42 = vld [vmem:[%s2513_s11 + $0x388] sm:$0xff] }
 0x191   : > { %1189 = vmatprep.mubr.bf16.mxu0 %v2606_v45  ;;  %1353 = vmatprep.mubr.bf16.mxu1 %v2606_v45 }
 0x193   : > { %1160 = vmatpush1.bf16.msra.mxu0 %v740_v46  ;;  %1324 = vmatpush1.bf16.msra.mxu1 %v742_v47  ;;  %v822_v46 = vunpack.c.h.s8.bf16 %v454_v36  ;;  %v829_v47 = vunpack.c.l.s8.bf16 %v461_v42 }
 0x194   : > { %1161 = vmatprep.subr.bf16.mxu0 %v749_v48  ;;  %1325 = vmatprep.subr.bf16.mxu1 %v751_v49  ;;  %v831_v48 = vunpack.c.l.s8.bf16 %v463_v43  ;;  %v460_v49 = vld [vmem:[%s2513_s11 + $0x380] sm:$0xff] }
 0x195   : > { %v828_v51 = vunpack.c.l.s8.bf16 %v460_v49  ;;  %v836_v57 = vunpack.c.h.s8.bf16 %v460_v49 }
 0x197   : > { %1162 = vmatpush1.bf16.msra.mxu0 %v748_v52  ;;  %1326 = vmatpush1.bf16.msra.mxu1 %v750_v53  ;;  %v830_v52 = vunpack.c.l.s8.bf16 %v462_v50  ;;  %v837_v53 = vunpack.c.h.s8.bf16 %v461_v42 }
 0x198   : > { %1163 = vmatprep.subr.bf16.mxu0 %v757_v54  ;;  %1327 = vmatprep.subr.bf16.mxu1 %v759_v55  ;;  %v839_v54 = vunpack.c.h.s8.bf16 %v463_v43  ;;  %v469_v55 = vld [vmem:[%s2513_s11 + $0x3c8] sm:$0xff] }
 0x19b   : > { %1164 = vmatpush1.bf16.msra.mxu0 %v756_v58  ;;  %1328 = vmatpush1.bf16.msra.mxu1 %v758_v59  ;;  %v838_v58 = vunpack.c.h.s8.bf16 %v462_v50  ;;  %v845_v59 = vunpack.c.l.s8.bf16 %v469_v55 }
 0x19c   : > { %1165 = vmatprep.subr.bf16.mxu0 %v765_v60  ;;  %1329 = vmatprep.subr.bf16.mxu1 %v767_v61  ;;  %v847_v60 = vunpack.c.l.s8.bf16 %v471_v56  ;;  %v468_v61 = vld [vmem:[%s2513_s11 + $0x3c0] sm:$0xff] }
 0x19d   : > { %v844_v63 = vunpack.c.l.s8.bf16 %v468_v61  ;;  %v852_v5 = vunpack.c.h.s8.bf16 %v468_v61 }
 0x19f   : > { %1166 = vmatpush1.bf16.msra.mxu0 %v764_v0  ;;  %1330 = vmatpush1.bf16.msra.mxu1 %v766_v1  ;;  %v846_v0 = vunpack.c.l.s8.bf16 %v470_v62  ;;  %v853_v1 = vunpack.c.h.s8.bf16 %v469_v55 }
 0x1a0   : > { %1167 = vmatprep.subr.bf16.mxu0 %v773_v2  ;;  %1331 = vmatprep.subr.bf16.mxu1 %v775_v3  ;;  %v855_v2 = vunpack.c.h.s8.bf16 %v471_v56  ;;  %v477_v3 = vld [vmem:[%s2513_s11 + $0x408] sm:$0xff] }
 0x1a1   : > { %v869_v16 = vunpack.c.h.s8.bf16 %v477_v3 }
 0x1a3   : > { %1168 = vmatpush1.bf16.msra.mxu0 %v772_v6  ;;  %1332 = vmatpush1.bf16.msra.mxu1 %v774_v7  ;;  %v854_v6 = vunpack.c.h.s8.bf16 %v470_v62  ;;  %v334_v7 = vld [vmem:[%s2995_s4 + $0x10] sm:$0xff] }
 0x1a4   : > { %1169 = vmatprep.subr.bf16.mxu0 %v781_v8  ;;  %1333 = vmatprep.subr.bf16.mxu1 %v783_v9  ;;  %v861_v8 = vunpack.c.l.s8.bf16 %v477_v3  ;;  %v863_v9 = vunpack.c.l.s8.bf16 %v479_v4 }
 0x1a7   : > { %1170 = vmatpush1.bf16.msra.mxu0 %v780_v12  ;;  %1334 = vmatpush1.bf16.msra.mxu1 %v782_v13  ;;  %v2645_v12 = vpack.c.bf16 %v334_v7, %v334_v7  ;;  %v337_v13 = vld [vmem:[%s2995_s4 + $0x28] sm:$0xff]  ;;  %v519_v7 = vld [vmem:[%s2513_s11 + $0x558] sm:$0xff] }
 0x1a8   : > { %1171 = vmatprep.subr.bf16.mxu0 %v789_v14  ;;  %1335 = vmatprep.subr.bf16.mxu1 %v791_v15  ;;  %v860_v14 = vunpack.c.l.s8.bf16 %v476_v10  ;;  %v862_v15 = vunpack.c.l.s8.bf16 %v478_v11  ;;  %v943_v11 = vunpack.c.l.s8.bf16 %v519_v7 }
 0x1ab   : > { %1172 = vmatpush1.bf16.msra.mxu0 %v788_v18  ;;  %1336 = vmatpush1.bf16.msra.mxu1 %v790_v19  ;;  %v485_v18 = vld [vmem:[%s2513_s11 + $0x448] sm:$0xff]  ;;  %v487_v19 = vld [vmem:[%s2513_s11 + $0x458] sm:$0xff] }
 0x1ac   : > { %1173 = vmatprep.subr.bf16.mxu0 %v797_v20  ;;  %1337 = vmatprep.subr.bf16.mxu1 %v799_v21  ;;  %v2652_v20 = vpack.c.bf16 %v337_v13, %v337_v13  ;;  %v868_v21 = vunpack.c.h.s8.bf16 %v476_v10  ;;  %v877_v23 = vunpack.c.l.s8.bf16 %v485_v18  ;;  %v885_v29 = vunpack.c.h.s8.bf16 %v485_v18  ;;  %v516_v13 = vld [vmem:[%s2513_s11 + $0x540] sm:$0xff] }
 0x1ad   : > { %v951_v18 = vunpack.c.h.s8.bf16 %v519_v7 }
 0x1af   : > { %1174 = vmatpush1.bf16.msra.mxu0 %v796_v24  ;;  %1338 = vmatpush1.bf16.msra.mxu1 %v798_v25  ;;  %v879_v24 = vunpack.c.l.s8.bf16 %v487_v19  ;;  %v484_v25 = vld [vmem:[%s2513_s11 + $0x440] sm:$0xff] }
 0x1b0   : > { %1175 = vmatprep.subr.bf16.mxu0 %v805_v26  ;;  %1339 = vmatprep.subr.bf16.mxu1 %v807_v27  ;;  %v486_v26 = vld [vmem:[%s2513_s11 + $0x450] sm:$0xff]  ;;  %v876_v27 = vunpack.c.l.s8.bf16 %v484_v25 }
 0x1b1   : > { %v878_v28 = vunpack.c.l.s8.bf16 %v486_v26  ;;  %v886_v35 = vunpack.c.h.s8.bf16 %v486_v26  ;;  %v524_v26 = vld [vmem:[%s2513_s11 + $0x580] sm:$0xff] }
 0x1b3   : > { %1176 = vmatpush1.bf16.msra.mxu0 %v804_v31  ;;  %1340 = vmatpush1.bf16.msra.mxu1 %v806_v32  ;;  %v887_v31 = vunpack.c.h.s8.bf16 %v487_v19  ;;  %v493_v32 = vld [vmem:[%s2513_s11 + $0x488] sm:$0xff] }
 0x1b4   : > { %1177 = vmatprep.subr.bf16.mxu0 %v813_v33  ;;  %1341 = vmatprep.subr.bf16.mxu1 %v815_v34  ;;  %v495_v33 = vld [vmem:[%s2513_s11 + $0x498] sm:$0xff]  ;;  %v884_v34 = vunpack.c.h.s8.bf16 %v484_v25  ;;  %v893_v36 = vunpack.c.l.s8.bf16 %v493_v32  ;;  %v901_v43 = vunpack.c.h.s8.bf16 %v493_v32  ;;  %v525_v19 = vld [vmem:[%s2513_s11 + $0x588] sm:$0xff] }
 0x1b7   : > { %1178 = vmatpush1.bf16.msra.mxu0 %v812_v38  ;;  %1342 = vmatpush1.bf16.msra.mxu1 %v814_v39  ;;  %v895_v38 = vunpack.c.l.s8.bf16 %v495_v33  ;;  %v492_v39 = vld [vmem:[%s2513_s11 + $0x480] sm:$0xff] }
 0x1b8   : > { %1179 = vmatprep.subr.bf16.mxu0 %v821_v40  ;;  %1343 = vmatprep.subr.bf16.mxu1 %v823_v41  ;;  %v494_v40 = vld [vmem:[%s2513_s11 + $0x490] sm:$0xff]  ;;  %v892_v41 = vunpack.c.l.s8.bf16 %v492_v39 }
 0x1b9   : > { %v894_v42 = vunpack.c.l.s8.bf16 %v494_v40  ;;  %v902_v49 = vunpack.c.h.s8.bf16 %v494_v40  ;;  %v532_v40 = vld [vmem:[%s2513_s11 + $0x5c0] sm:$0xff] }
 0x1bb   : > { %1180 = vmatpush1.bf16.msra.mxu0 %v820_v44  ;;  %1344 = vmatpush1.bf16.msra.mxu1 %v822_v46  ;;  %v903_v44 = vunpack.c.h.s8.bf16 %v495_v33  ;;  %v501_v46 = vld [vmem:[%s2513_s11 + $0x4c8] sm:$0xff] }
 0x1bc   : > { %1181 = vmatprep.subr.bf16.mxu0 %v829_v47  ;;  %1345 = vmatprep.subr.bf16.mxu1 %v831_v48  ;;  %v503_v47 = vld [vmem:[%s2513_s11 + $0x4d8] sm:$0xff]  ;;  %v900_v48 = vunpack.c.h.s8.bf16 %v492_v39  ;;  %v909_v50 = vunpack.c.l.s8.bf16 %v501_v46  ;;  %v917_v56 = vunpack.c.h.s8.bf16 %v501_v46  ;;  %v533_v33 = vld [vmem:[%s2513_s11 + $0x5c8] sm:$0xff] }
 0x1bf   : > { %1182 = vmatpush1.bf16.msra.mxu0 %v828_v51  ;;  %1346 = vmatpush1.bf16.msra.mxu1 %v830_v52  ;;  %v911_v51 = vunpack.c.l.s8.bf16 %v503_v47  ;;  %v500_v52 = vld [vmem:[%s2513_s11 + $0x4c0] sm:$0xff] }
 0x1c0   : > { %1183 = vmatprep.subr.bf16.mxu0 %v837_v53  ;;  %1347 = vmatprep.subr.bf16.mxu1 %v839_v54  ;;  %v502_v53 = vld [vmem:[%s2513_s11 + $0x4d0] sm:$0xff]  ;;  %v908_v54 = vunpack.c.l.s8.bf16 %v500_v52 }
 0x1c1   : > { %v910_v55 = vunpack.c.l.s8.bf16 %v502_v53  ;;  %v918_v61 = vunpack.c.h.s8.bf16 %v502_v53 }
 0x1c3   : > { %1184 = vmatpush1.bf16.msra.mxu0 %v836_v57  ;;  %1348 = vmatpush1.bf16.msra.mxu1 %v838_v58  ;;  %v919_v57 = vunpack.c.h.s8.bf16 %v503_v47  ;;  %v509_v58 = vld [vmem:[%s2513_s11 + $0x508] sm:$0xff] }
 0x1c4   : > { %1185 = vmatprep.subr.bf16.mxu0 %v845_v59  ;;  %1349 = vmatprep.subr.bf16.mxu1 %v847_v60  ;;  %v511_v59 = vld [vmem:[%s2513_s11 + $0x518] sm:$0xff]  ;;  %v916_v60 = vunpack.c.h.s8.bf16 %v500_v52  ;;  %v925_v62 = vunpack.c.l.s8.bf16 %v509_v58  ;;  %v933_v4 = vunpack.c.h.s8.bf16 %v509_v58  ;;  %v541_v47 = vld [vmem:[%s2513_s11 + $0x608] sm:$0xff] }
 0x1c5   : > { %v989_v52 = vunpack.c.l.s8.bf16 %v541_v47 }
 0x1c7   : > { %1186 = vmatpush1.bf16.msra.mxu0 %v844_v63  ;;  %1350 = vmatpush1.bf16.msra.mxu1 %v846_v0  ;;  %v927_v63 = vunpack.c.l.s8.bf16 %v511_v59  ;;  %v508_v0 = vld [vmem:[%s2513_s11 + $0x500] sm:$0xff] }
 0x1c8   : > { %1187 = vmatprep.subr.bf16.mxu0 %v853_v1  ;;  %1351 = vmatprep.subr.bf16.mxu1 %v855_v2  ;;  %v510_v1 = vld [vmem:[%s2513_s11 + $0x510] sm:$0xff]  ;;  %v924_v2 = vunpack.c.l.s8.bf16 %v508_v0 }
 0x1c9   : > { %v926_v3 = vunpack.c.l.s8.bf16 %v510_v1 }
 0x1cb   : > { %1188 = vmatpush1.bf16.msra.mxu0 %v852_v5  ;;  %1352 = vmatpush1.bf16.msra.mxu1 %v854_v6  ;;  %v935_v5 = vunpack.c.h.s8.bf16 %v511_v59  ;;  %v517_v6 = vld [vmem:[%s2513_s11 + $0x548] sm:$0xff] }
 0x1cc   : > { %1198 = vmatprep.subr.bf16.mxu0 %v861_v8  ;;  %1362 = vmatprep.subr.bf16.mxu1 %v863_v9  ;;  %v932_v8 = vunpack.c.h.s8.bf16 %v508_v0  ;;  %v934_v9 = vunpack.c.h.s8.bf16 %v510_v1  ;;  %v941_v10 = vunpack.c.l.s8.bf16 %v517_v6 }
 0x1ce   : > { %1190 = vmatmul.mubr.bf16.vlgmr.msra.gmra.mrb[0].mxu0 %v2645_v12  ;;  %1354 = vmatmul.mubr.bf16.vlgmr.msra.gmra.mrb[0].mxu1 %v2645_v12 }
 0x1cf   : > { %1199 = vmatpush1.bf16.msra.mxu0 %v860_v14  ;;  %1363 = vmatpush1.bf16.msra.mxu1 %v862_v15  ;;  %v518_v14 = vld [vmem:[%s2513_s11 + $0x550] sm:$0xff]  ;;  %v940_v15 = vunpack.c.l.s8.bf16 %v516_v13 }
 0x1d0   : > { %1200 = vmatprep.subr.bf16.mxu0 %v869_v16  ;;  %1364 = vmatprep.subr.bf16.mxu1 %v871_v17  ;;  %v942_v16 = vunpack.c.l.s8.bf16 %v518_v14  ;;  %v949_v17 = vunpack.c.h.s8.bf16 %v517_v6  ;;  %v550_v6 = vld [vmem:[%s2513_s11 + $0x650] sm:$0xff] }
 0x1d1   : > { %1230 = vmatprep.mubr.bf16.mxu0 %v2652_v20  ;;  %1394 = vmatprep.mubr.bf16.mxu1 %v2652_v20 }
 0x1d3   : > { %1201 = vmatpush1.bf16.msra.mxu0 %v868_v21  ;;  %1365 = vmatpush1.bf16.msra.mxu1 %v870_v22  ;;  %v527_v21 = vld [vmem:[%s2513_s11 + $0x598] sm:$0xff]  ;;  %v948_v22 = vunpack.c.h.s8.bf16 %v516_v13 }
 0x1d4   : > { %1202 = vmatprep.subr.bf16.mxu0 %v877_v23  ;;  %1366 = vmatprep.subr.bf16.mxu1 %v879_v24  ;;  %v950_v23 = vunpack.c.h.s8.bf16 %v518_v14  ;;  %v957_v24 = vunpack.c.l.s8.bf16 %v525_v19  ;;  %v959_v25 = vunpack.c.l.s8.bf16 %v527_v21  ;;  %v967_v32 = vunpack.c.h.s8.bf16 %v527_v21  ;;  %v559_v13 = vld [vmem:[%s2513_s11 + $0x698] sm:$0xff] }
 0x1d7   : > { %1203 = vmatpush1.bf16.msra.mxu0 %v876_v27  ;;  %1367 = vmatpush1.bf16.msra.mxu1 %v878_v28  ;;  %v526_v27 = vld [vmem:[%s2513_s11 + $0x590] sm:$0xff]  ;;  %v956_v28 = vunpack.c.l.s8.bf16 %v524_v26 }
 0x1d8   : > { %1204 = vmatprep.subr.bf16.mxu0 %v885_v29  ;;  %1368 = vmatprep.subr.bf16.mxu1 %v887_v31  ;;  %v958_v29 = vunpack.c.l.s8.bf16 %v526_v27  ;;  %v965_v31 = vunpack.c.h.s8.bf16 %v525_v19  ;;  %v558_v19 = vld [vmem:[%s2513_s11 + $0x690] sm:$0xff] }
 0x1db   : > { %1205 = vmatpush1.bf16.msra.mxu0 %v884_v34  ;;  %1369 = vmatpush1.bf16.msra.mxu1 %v886_v35  ;;  %v535_v34 = vld [vmem:[%s2513_s11 + $0x5d8] sm:$0xff]  ;;  %v964_v35 = vunpack.c.h.s8.bf16 %v524_v26 }
 0x1dc   : > { %1206 = vmatprep.subr.bf16.mxu0 %v893_v36  ;;  %1370 = vmatprep.subr.bf16.mxu1 %v895_v38  ;;  %v966_v36 = vunpack.c.h.s8.bf16 %v526_v27  ;;  %v973_v38 = vunpack.c.l.s8.bf16 %v533_v33  ;;  %v975_v39 = vunpack.c.l.s8.bf16 %v535_v34  ;;  %v983_v46 = vunpack.c.h.s8.bf16 %v535_v34  ;;  %v567_v26 = vld [vmem:[%s2513_s11 + $0x6d8] sm:$0xff] }
 0x1df   : > { %1207 = vmatpush1.bf16.msra.mxu0 %v892_v41  ;;  %1371 = vmatpush1.bf16.msra.mxu1 %v894_v42  ;;  %v534_v41 = vld [vmem:[%s2513_s11 + $0x5d0] sm:$0xff]  ;;  %v972_v42 = vunpack.c.l.s8.bf16 %v532_v40 }
 0x1e0   : > { %1208 = vmatprep.subr.bf16.mxu0 %v901_v43  ;;  %1372 = vmatprep.subr.bf16.mxu1 %v903_v44  ;;  %v974_v43 = vunpack.c.l.s8.bf16 %v534_v41  ;;  %v981_v44 = vunpack.c.h.s8.bf16 %v533_v33  ;;  %v566_v33 = vld [vmem:[%s2513_s11 + $0x6d0] sm:$0xff] }
 0x1e3   : > { %1209 = vmatpush1.bf16.msra.mxu0 %v900_v48  ;;  %1373 = vmatpush1.bf16.msra.mxu1 %v902_v49  ;;  %v543_v48 = vld [vmem:[%s2513_s11 + $0x618] sm:$0xff]  ;;  %v980_v49 = vunpack.c.h.s8.bf16 %v532_v40 }
 0x1e4   : > { %1210 = vmatprep.subr.bf16.mxu0 %v909_v50  ;;  %1374 = vmatprep.subr.bf16.mxu1 %v911_v51  ;;  %v982_v50 = vunpack.c.h.s8.bf16 %v534_v41  ;;  %v336_v51 = vld [vmem:[%s2995_s4 + $0x20] sm:$0xff]  ;;  %v991_v53 = vunpack.c.l.s8.bf16 %v543_v48  ;;  %v575_v40 = vld [vmem:[%s2513_s11 + $0x718] sm:$0xff] }
 0x1e7   : > { %1211 = vmatpush1.bf16.msra.mxu0 %v908_v54  ;;  %1375 = vmatpush1.bf16.msra.mxu1 %v910_v55  ;;  %v540_v54 = vld [vmem:[%s2513_s11 + $0x600] sm:$0xff]  ;;  %v542_v55 = vld [vmem:[%s2513_s11 + $0x610] sm:$0xff] }
 0x1e8   : > { %1212 = vmatprep.subr.bf16.mxu0 %v917_v56  ;;  %1376 = vmatprep.subr.bf16.mxu1 %v919_v57  ;;  %v2691_v56 = vpack.c.bf16 %v336_v51, %v336_v51  ;;  %v339_v57 = vld [vmem:[%s2995_s4 + $0x38] sm:$0xff]  ;;  %v988_v58 = vunpack.c.l.s8.bf16 %v540_v54  ;;  %v990_v59 = vunpack.c.l.s8.bf16 %v542_v55  ;;  %v996_v1 = vunpack.c.h.s8.bf16 %v540_v54 }
 0x1e9   : > { %v2698_v0 = vpack.c.bf16 %v339_v57, %v339_v57  ;;  %v1063_v51 = vunpack.c.h.s8.bf16 %v575_v40 }
 0x1eb   : > { %1213 = vmatpush1.bf16.msra.mxu0 %v916_v60  ;;  %1377 = vmatpush1.bf16.msra.mxu1 %v918_v61  ;;  %v997_v60 = vunpack.c.h.s8.bf16 %v541_v47  ;;  %v999_v61 = vunpack.c.h.s8.bf16 %v543_v48  ;;  %v574_v47 = vld [vmem:[%s2513_s11 + $0x710] sm:$0xff] }
 0x1ec   : > { %1214 = vmatprep.subr.bf16.mxu0 %v925_v62  ;;  %1378 = vmatprep.subr.bf16.mxu1 %v927_v63  ;;  %v549_v62 = vld [vmem:[%s2513_s11 + $0x648] sm:$0xff]  ;;  %v551_v63 = vld [vmem:[%s2513_s11 + $0x658] sm:$0xff] }
 0x1ef   : > { %1215 = vmatpush1.bf16.msra.mxu0 %v924_v2  ;;  %1379 = vmatpush1.bf16.msra.mxu1 %v926_v3  ;;  %v998_v2 = vunpack.c.h.s8.bf16 %v542_v55  ;;  %v1005_v3 = vunpack.c.l.s8.bf16 %v549_v62  ;;  %v1062_v55 = vunpack.c.h.s8.bf16 %v574_v47 }
 0x1f0   : > { %1216 = vmatprep.subr.bf16.mxu0 %v933_v4  ;;  %1380 = vmatprep.subr.bf16.mxu1 %v935_v5  ;;  %v1007_v4 = vunpack.c.l.s8.bf16 %v551_v63  ;;  %v548_v5 = vld [vmem:[%s2513_s11 + $0x640] sm:$0xff] }
 0x1f1   : > { %v1004_v7 = vunpack.c.l.s8.bf16 %v548_v5  ;;  %v1012_v14 = vunpack.c.h.s8.bf16 %v548_v5 }
 0x1f3   : > { %1217 = vmatpush1.bf16.msra.mxu0 %v932_v8  ;;  %1381 = vmatpush1.bf16.msra.mxu1 %v934_v9  ;;  %v1006_v8 = vunpack.c.l.s8.bf16 %v550_v6  ;;  %v1013_v9 = vunpack.c.h.s8.bf16 %v549_v62 }
 0x1f4   : > { %1218 = vmatprep.subr.bf16.mxu0 %v941_v10  ;;  %1382 = vmatprep.subr.bf16.mxu1 %v943_v11  ;;  %v1015_v10 = vunpack.c.h.s8.bf16 %v551_v63  ;;  %v557_v11 = vld [vmem:[%s2513_s11 + $0x688] sm:$0xff] }
 0x1f7   : > { %1219 = vmatpush1.bf16.msra.mxu0 %v940_v15  ;;  %1383 = vmatpush1.bf16.msra.mxu1 %v942_v16  ;;  %v1014_v15 = vunpack.c.h.s8.bf16 %v550_v6  ;;  %v1021_v16 = vunpack.c.l.s8.bf16 %v557_v11 }
 0x1f8   : > { %1220 = vmatprep.subr.bf16.mxu0 %v949_v17  ;;  %1384 = vmatprep.subr.bf16.mxu1 %v951_v18  ;;  %v1023_v17 = vunpack.c.l.s8.bf16 %v559_v13  ;;  %v556_v18 = vld [vmem:[%s2513_s11 + $0x680] sm:$0xff] }
 0x1f9   : > { %v1020_v21 = vunpack.c.l.s8.bf16 %v556_v18  ;;  %v1028_v27 = vunpack.c.h.s8.bf16 %v556_v18 }
 0x1fb   : > { %1221 = vmatpush1.bf16.msra.mxu0 %v948_v22  ;;  %1385 = vmatpush1.bf16.msra.mxu1 %v950_v23  ;;  %v1022_v22 = vunpack.c.l.s8.bf16 %v558_v19  ;;  %v1029_v23 = vunpack.c.h.s8.bf16 %v557_v11 }
 0x1fc   : > { %1222 = vmatprep.subr.bf16.mxu0 %v957_v24  ;;  %1386 = vmatprep.subr.bf16.mxu1 %v959_v25  ;;  %v1031_v24 = vunpack.c.h.s8.bf16 %v559_v13  ;;  %v565_v25 = vld [vmem:[%s2513_s11 + $0x6c8] sm:$0xff] }
 0x1ff   : > { %1223 = vmatpush1.bf16.msra.mxu0 %v956_v28  ;;  %1387 = vmatpush1.bf16.msra.mxu1 %v958_v29  ;;  %v1030_v28 = vunpack.c.h.s8.bf16 %v558_v19  ;;  %v1037_v29 = vunpack.c.l.s8.bf16 %v565_v25 }
 0x200   : > { %1224 = vmatprep.subr.bf16.mxu0 %v965_v31  ;;  %1388 = vmatprep.subr.bf16.mxu1 %v967_v32  ;;  %v1039_v31 = vunpack.c.l.s8.bf16 %v567_v26  ;;  %v564_v32 = vld [vmem:[%s2513_s11 + $0x6c0] sm:$0xff] }
 0x201   : > { %v1036_v34 = vunpack.c.l.s8.bf16 %v564_v32  ;;  %v1044_v41 = vunpack.c.h.s8.bf16 %v564_v32 }
 0x203   : > { %1225 = vmatpush1.bf16.msra.mxu0 %v964_v35  ;;  %1389 = vmatpush1.bf16.msra.mxu1 %v966_v36  ;;  %v1038_v35 = vunpack.c.l.s8.bf16 %v566_v33  ;;  %v1045_v36 = vunpack.c.h.s8.bf16 %v565_v25 }
 0x204   : > { %1226 = vmatprep.subr.bf16.mxu0 %v973_v38  ;;  %1390 = vmatprep.subr.bf16.mxu1 %v975_v39  ;;  %v1047_v38 = vunpack.c.h.s8.bf16 %v567_v26  ;;  %v573_v39 = vld [vmem:[%s2513_s11 + $0x708] sm:$0xff] }
 0x207   : > { %1227 = vmatpush1.bf16.msra.mxu0 %v972_v42  ;;  %1391 = vmatpush1.bf16.msra.mxu1 %v974_v43  ;;  %v1046_v42 = vunpack.c.h.s8.bf16 %v566_v33  ;;  %v1053_v43 = vunpack.c.l.s8.bf16 %v573_v39  ;;  %v338_v33 = vld [vmem:[%s2995_s4 + $0x30] sm:$0xff] }
 0x208   : > { %1228 = vmatprep.subr.bf16.mxu0 %v981_v44  ;;  %1392 = vmatprep.subr.bf16.mxu1 %v983_v46  ;;  %v1055_v44 = vunpack.c.l.s8.bf16 %v575_v40  ;;  %v572_v46 = vld [vmem:[%s2513_s11 + $0x700] sm:$0xff] }
 0x209   : > { %v1052_v48 = vunpack.c.l.s8.bf16 %v572_v46  ;;  %v1060_v54 = vunpack.c.h.s8.bf16 %v572_v46  ;;  %v363_v46 = vld [vmem:[%s2513_s11 + $0x78] sm:$0xff] }
 0x20b   : > { %1229 = vmatpush1.bf16.msra.mxu0 %v980_v49  ;;  %1393 = vmatpush1.bf16.msra.mxu1 %v982_v50  ;;  %v1054_v49 = vunpack.c.l.s8.bf16 %v574_v47  ;;  %v1061_v50 = vunpack.c.h.s8.bf16 %v573_v39  ;;  %v2737_v39 = vpack.c.bf16 %v338_v33, %v338_v33  ;;  %v393_v33 = vld [vmem:[%s2513_s11 + $0x168] sm:$0xff] }
 0x20c   : > { %1239 = vmatprep.subr.bf16.mxu0 %v989_v52  ;;  %1403 = vmatprep.subr.bf16.mxu1 %v991_v53  ;;  %v581_v52 = vld [vmem:[%s2513_s11 + $0x748] sm:$0xff]  ;;  %v583_v53 = vld [vmem:[%s2513_s11 + $0x758] sm:$0xff] }
 0x20d   : > { %v1069_v57 = vunpack.c.l.s8.bf16 %v581_v52  ;;  %v1077_v63 = vunpack.c.h.s8.bf16 %v581_v52  ;;  %v362_v52 = vld [vmem:[%s2513_s11 + $0x70] sm:$0xff] }
 0x20e   : > { %1231 = vmatmul.mubr.bf16.vlgmr.msra.gmra.mrb[0].mxu0 %v2691_v56  ;;  %1395 = vmatmul.mubr.bf16.vlgmr.msra.gmra.mrb[0].mxu1 %v2691_v56 }
 0x20f   : > { %1240 = vmatpush1.bf16.msra.mxu0 %v988_v58  ;;  %1404 = vmatpush1.bf16.msra.mxu1 %v990_v59  ;;  %v1071_v58 = vunpack.c.l.s8.bf16 %v583_v53  ;;  %v580_v59 = vld [vmem:[%s2513_s11 + $0x740] sm:$0xff] }
 0x210   : > { %1241 = vmatprep.subr.bf16.mxu0 %v997_v60  ;;  %1405 = vmatprep.subr.bf16.mxu1 %v999_v61  ;;  %v582_v60 = vld [vmem:[%s2513_s11 + $0x750] sm:$0xff]  ;;  %v1068_v61 = vunpack.c.l.s8.bf16 %v580_v59 }
 0x211   : > { %1271 = vmatprep.mubr.bf16.mxu0 %v2698_v0  ;;  %1435 = vmatprep.mubr.bf16.mxu1 %v2698_v0  ;;  %v1070_v62 = vunpack.c.l.s8.bf16 %v582_v60  ;;  %v1078_v5 = vunpack.c.h.s8.bf16 %v582_v60 }
 0x213   : > { %1242 = vmatpush1.bf16.msra.mxu0 %v996_v1  ;;  %1406 = vmatpush1.bf16.msra.mxu1 %v998_v2  ;;  %v1079_v1 = vunpack.c.h.s8.bf16 %v583_v53  ;;  %v589_v2 = vld [vmem:[%s2513_s11 + $0x788] sm:$0xff] }
 0x214   : > { %1243 = vmatprep.subr.bf16.mxu0 %v1005_v3  ;;  %1407 = vmatprep.subr.bf16.mxu1 %v1007_v4  ;;  %v591_v3 = vld [vmem:[%s2513_s11 + $0x798] sm:$0xff]  ;;  %v1076_v4 = vunpack.c.h.s8.bf16 %v580_v59  ;;  %v1085_v6 = vunpack.c.l.s8.bf16 %v589_v2  ;;  %v1093_v13 = vunpack.c.h.s8.bf16 %v589_v2 }
 0x215   : > { %v371_v59 = vld [vmem:[%s2513_s11 + $0xb8] sm:$0xff] }
 0x217   : > { %1244 = vmatpush1.bf16.msra.mxu0 %v1004_v7  ;;  %1408 = vmatpush1.bf16.msra.mxu1 %v1006_v8  ;;  %v1087_v7 = vunpack.c.l.s8.bf16 %v591_v3  ;;  %v588_v8 = vld [vmem:[%s2513_s11 + $0x780] sm:$0xff] }
 0x218   : > { %1245 = vmatprep.subr.bf16.mxu0 %v1013_v9  ;;  %1409 = vmatprep.subr.bf16.mxu1 %v1015_v10  ;;  %v590_v9 = vld [vmem:[%s2513_s11 + $0x790] sm:$0xff]  ;;  %v1084_v10 = vunpack.c.l.s8.bf16 %v588_v8 }
 0x219   : > { %v1086_v11 = vunpack.c.l.s8.bf16 %v590_v9  ;;  %v1094_v18 = vunpack.c.h.s8.bf16 %v590_v9 }
 0x21b   : > { %1246 = vmatpush1.bf16.msra.mxu0 %v1012_v14  ;;  %1410 = vmatpush1.bf16.msra.mxu1 %v1014_v15  ;;  %v1095_v14 = vunpack.c.h.s8.bf16 %v591_v3  ;;  %v597_v15 = vld [vmem:[%s2513_s11 + $0x7c8] sm:$0xff] }
 0x21c   : > { %1247 = vmatprep.subr.bf16.mxu0 %v1021_v16  ;;  %1411 = vmatprep.subr.bf16.mxu1 %v1023_v17  ;;  %v599_v16 = vld [vmem:[%s2513_s11 + $0x7d8] sm:$0xff]  ;;  %v1092_v17 = vunpack.c.h.s8.bf16 %v588_v8  ;;  %v1101_v19 = vunpack.c.l.s8.bf16 %v597_v15  ;;  %v1109_v26 = vunpack.c.h.s8.bf16 %v597_v15 }
 0x21f   : > { %1248 = vmatpush1.bf16.msra.mxu0 %v1020_v21  ;;  %1412 = vmatpush1.bf16.msra.mxu1 %v1022_v22  ;;  %v1103_v21 = vunpack.c.l.s8.bf16 %v599_v16  ;;  %v596_v22 = vld [vmem:[%s2513_s11 + $0x7c0] sm:$0xff] }
 0x220   : > { %1249 = vmatprep.subr.bf16.mxu0 %v1029_v23  ;;  %1413 = vmatprep.subr.bf16.mxu1 %v1031_v24  ;;  %v598_v23 = vld [vmem:[%s2513_s11 + $0x7d0] sm:$0xff]  ;;  %v1100_v24 = vunpack.c.l.s8.bf16 %v596_v22 }
 0x221   : > { %v1102_v25 = vunpack.c.l.s8.bf16 %v598_v23  ;;  %v1110_v32 = vunpack.c.h.s8.bf16 %v598_v23 }
 0x223   : > { %1250 = vmatpush1.bf16.msra.mxu0 %v1028_v27  ;;  %1414 = vmatpush1.bf16.msra.mxu1 %v1030_v28  ;;  %v1111_v27 = vunpack.c.h.s8.bf16 %v599_v16  ;;  %v353_v28 = vld [vmem:[%s2513_s11 + $0x28] sm:$0xff] }
 0x224   : > { %1251 = vmatprep.subr.bf16.mxu0 %v1037_v29  ;;  %1415 = vmatprep.subr.bf16.mxu1 %v1039_v31  ;;  %v355_v29 = vld [vmem:[%s2513_s11 + $0x38] sm:$0xff]  ;;  %v1108_v31 = vunpack.c.h.s8.bf16 %v596_v22 }
 0x227   : > { %1252 = vmatpush1.bf16.msra.mxu0 %v1036_v34  ;;  %1416 = vmatpush1.bf16.msra.mxu1 %v1038_v35  ;;  %v609_v34 = vunpack.c.l.s8.bf16 %v353_v28  ;;  %v611_v35 = vunpack.c.l.s8.bf16 %v355_v29 }
 0x228   : > { %1253 = vmatprep.subr.bf16.mxu0 %v1045_v36  ;;  %1417 = vmatprep.subr.bf16.mxu1 %v1047_v38  ;;  %v352_v36 = vld [vmem:[%s2513_s11 + $0x20] sm:$0xff]  ;;  %v354_v38 = vld [vmem:[%s2513_s11 + $0x30] sm:$0xff] }
 0x229   : > { %v608_v40 = vunpack.c.l.s8.bf16 %v352_v36  ;;  %v616_v47 = vunpack.c.h.s8.bf16 %v352_v36 }
 0x22b   : > { %1254 = vmatpush1.bf16.msra.mxu0 %v1044_v41  ;;  %1418 = vmatpush1.bf16.msra.mxu1 %v1046_v42  ;;  %v610_v41 = vunpack.c.l.s8.bf16 %v354_v38  ;;  %v617_v42 = vunpack.c.h.s8.bf16 %v353_v28 }
 0x22c   : > { %1255 = vmatprep.subr.bf16.mxu0 %v1053_v43  ;;  %1419 = vmatprep.subr.bf16.mxu1 %v1055_v44  ;;  %v619_v43 = vunpack.c.h.s8.bf16 %v355_v29  ;;  %v361_v44 = vld [vmem:[%s2513_s11 + $0x68] sm:$0xff] }
 0x22f   : > { %1256 = vmatpush1.bf16.msra.mxu0 %v1052_v48  ;;  %1420 = vmatpush1.bf16.msra.mxu1 %v1054_v49  ;;  %v618_v48 = vunpack.c.h.s8.bf16 %v354_v38  ;;  %v625_v49 = vunpack.c.l.s8.bf16 %v361_v44  ;;  %v689_v38 = vunpack.c.l.s8.bf16 %v393_v33 }
 0x230   : > { %1257 = vmatprep.subr.bf16.mxu0 %v1061_v50  ;;  %1421 = vmatprep.subr.bf16.mxu1 %v1063_v51  ;;  %v627_v50 = vunpack.c.l.s8.bf16 %v363_v46  ;;  %v360_v51 = vld [vmem:[%s2513_s11 + $0x60] sm:$0xff] }
 0x231   : > { %v624_v53 = vunpack.c.l.s8.bf16 %v360_v51  ;;  %v632_v60 = vunpack.c.h.s8.bf16 %v360_v51 }
 0x233   : > { %1258 = vmatpush1.bf16.msra.mxu0 %v1060_v54  ;;  %1422 = vmatpush1.bf16.msra.mxu1 %v1062_v55  ;;  %v626_v54 = vunpack.c.l.s8.bf16 %v362_v52  ;;  %v633_v55 = vunpack.c.h.s8.bf16 %v361_v44 }
 0x234   : > { %1259 = vmatprep.subr.bf16.mxu0 %v1069_v57  ;;  %1423 = vmatprep.subr.bf16.mxu1 %v1071_v58  ;;  %v635_v57 = vunpack.c.h.s8.bf16 %v363_v46  ;;  %v369_v58 = vld [vmem:[%s2513_s11 + $0xa8] sm:$0xff]  ;;  %v697_v46 = vunpack.c.h.s8.bf16 %v393_v33 }
 0x237   : > { %1260 = vmatpush1.bf16.msra.mxu0 %v1068_v61  ;;  %1424 = vmatpush1.bf16.msra.mxu1 %v1070_v62  ;;  %v634_v61 = vunpack.c.h.s8.bf16 %v362_v52  ;;  %v643_v62 = vunpack.c.l.s8.bf16 %v371_v59 }
 0x238   : > { %1261 = vmatprep.subr.bf16.mxu0 %v1077_v63  ;;  %1425 = vmatprep.subr.bf16.mxu1 %v1079_v1  ;;  %v368_v63 = vld [vmem:[%s2513_s11 + $0xa0] sm:$0xff]  ;;  %v370_v1 = vld [vmem:[%s2513_s11 + $0xb0] sm:$0xff] }
 0x239   : > { %v640_v2 = vunpack.c.l.s8.bf16 %v368_v63  ;;  %v642_v3 = vunpack.c.l.s8.bf16 %v370_v1  ;;  %v648_v8 = vunpack.c.h.s8.bf16 %v368_v63  ;;  %v650_v9 = vunpack.c.h.s8.bf16 %v370_v1 }
 0x23b   : > { %1262 = vmatpush1.bf16.msra.mxu0 %v1076_v4  ;;  %1426 = vmatpush1.bf16.msra.mxu1 %v1078_v5  ;;  %v649_v4 = vunpack.c.h.s8.bf16 %v369_v58  ;;  %v651_v5 = vunpack.c.h.s8.bf16 %v371_v59 }
 0x23c   : > { %1263 = vmatprep.subr.bf16.mxu0 %v1085_v6  ;;  %1427 = vmatprep.subr.bf16.mxu1 %v1087_v7  ;;  %v377_v6 = vld [vmem:[%s2513_s11 + $0xe8] sm:$0xff]  ;;  %v379_v7 = vld [vmem:[%s2513_s11 + $0xf8] sm:$0xff] }
 0x23f   : > { %1264 = vmatpush1.bf16.msra.mxu0 %v1084_v10  ;;  %1428 = vmatpush1.bf16.msra.mxu1 %v1086_v11  ;;  %v657_v10 = vunpack.c.l.s8.bf16 %v377_v6  ;;  %v659_v11 = vunpack.c.l.s8.bf16 %v379_v7 }
 0x240   : > { %1265 = vmatprep.subr.bf16.mxu0 %v1093_v13  ;;  %1429 = vmatprep.subr.bf16.mxu1 %v1095_v14  ;;  %v376_v13 = vld [vmem:[%s2513_s11 + $0xe0] sm:$0xff]  ;;  %v378_v14 = vld [vmem:[%s2513_s11 + $0xf0] sm:$0xff] }
 0x241   : > { %v656_v15 = vunpack.c.l.s8.bf16 %v376_v13  ;;  %v658_v16 = vunpack.c.l.s8.bf16 %v378_v14  ;;  %v664_v22 = vunpack.c.h.s8.bf16 %v376_v13  ;;  %v666_v23 = vunpack.c.h.s8.bf16 %v378_v14 }
 0x243   : > { %1266 = vmatpush1.bf16.msra.mxu0 %v1092_v17  ;;  %1430 = vmatpush1.bf16.msra.mxu1 %v1094_v18  ;;  %v665_v17 = vunpack.c.h.s8.bf16 %v377_v6  ;;  %v667_v18 = vunpack.c.h.s8.bf16 %v379_v7 }
 0x244   : > { %1267 = vmatprep.subr.bf16.mxu0 %v1101_v19  ;;  %1431 = vmatprep.subr.bf16.mxu1 %v1103_v21  ;;  %v385_v19 = vld [vmem:[%s2513_s11 + $0x128] sm:$0xff]  ;;  %v387_v21 = vld [vmem:[%s2513_s11 + $0x138] sm:$0xff] }
 0x247   : > { %1268 = vmatpush1.bf16.msra.mxu0 %v1100_v24  ;;  %1432 = vmatpush1.bf16.msra.mxu1 %v1102_v25  ;;  %v673_v24 = vunpack.c.l.s8.bf16 %v385_v19  ;;  %v675_v25 = vunpack.c.l.s8.bf16 %v387_v21 }
 0x248   : > { %1269 = vmatprep.subr.bf16.mxu0 %v1109_v26  ;;  %1433 = vmatprep.subr.bf16.mxu1 %v1111_v27  ;;  %v384_v26 = vld [vmem:[%s2513_s11 + $0x120] sm:$0xff]  ;;  %v386_v27 = vld [vmem:[%s2513_s11 + $0x130] sm:$0xff] }
 0x249   : > { %v672_v28 = vunpack.c.l.s8.bf16 %v384_v26  ;;  %v674_v29 = vunpack.c.l.s8.bf16 %v386_v27  ;;  %v682_v36 = vunpack.c.h.s8.bf16 %v386_v27 }
 0x24b   : > { %1270 = vmatpush1.bf16.msra.mxu0 %v1108_v31  ;;  %1434 = vmatpush1.bf16.msra.mxu1 %v1110_v32  ;;  %v681_v31 = vunpack.c.h.s8.bf16 %v385_v19  ;;  %v683_v32 = vunpack.c.h.s8.bf16 %v387_v21 }
 0x24c   : > { %1444 = vmatprep.subr.bf16.mxu0 %v609_v34  ;;  %1608 = vmatprep.subr.bf16.mxu1 %v611_v35  ;;  %v395_v34 = vld [vmem:[%s2513_s11 + $0x178] sm:$0xff]  ;;  %v680_v35 = vunpack.c.h.s8.bf16 %v384_v26 }
 0x24e   : > { %1272 = vmatmul.mubr.bf16.vlgmr.msra.gmra.mrb[0].mxu0 %v2737_v39  ;;  %1436 = vmatmul.mubr.bf16.vlgmr.msra.gmra.mrb[0].mxu1 %v2737_v39 }
 0x24f   : > { %1445 = vmatpush1.bf16.msra.mxu0 %v608_v40  ;;  %1609 = vmatpush1.bf16.msra.mxu1 %v610_v41  ;;  %v691_v40 = vunpack.c.l.s8.bf16 %v395_v34  ;;  %v392_v41 = vld [vmem:[%s2513_s11 + $0x160] sm:$0xff] }
 0x250   : > { %1446 = vmatprep.subr.bf16.mxu0 %v617_v42  ;;  %1610 = vmatprep.subr.bf16.mxu1 %v619_v43  ;;  %v394_v42 = vld [vmem:[%s2513_s11 + $0x170] sm:$0xff]  ;;  %v688_v43 = vunpack.c.l.s8.bf16 %v392_v41 }
 0x251   : > { %1476 = vmatprep.mubr.bf16.mxu0 %v2568_v30  ;;  %1640 = vmatprep.mubr.bf16.mxu1 %v2568_v30  ;;  %v641_v30 = vunpack.c.l.s8.bf16 %v369_v58  ;;  %v690_v44 = vunpack.c.l.s8.bf16 %v394_v42  ;;  %v698_v51 = vunpack.c.h.s8.bf16 %v394_v42  ;;  %v432_v42 = vld [vmem:[%s2513_s11 + $0x2a0] sm:$0xff] }
 0x253   : > { %1447 = vmatpush1.bf16.msra.mxu0 %v616_v47  ;;  %1611 = vmatpush1.bf16.msra.mxu1 %v618_v48  ;;  %v699_v47 = vunpack.c.h.s8.bf16 %v395_v34  ;;  %v401_v48 = vld [vmem:[%s2513_s11 + $0x1a8] sm:$0xff] }
 0x254   : > { %1448 = vmatprep.subr.bf16.mxu0 %v625_v49  ;;  %1612 = vmatprep.subr.bf16.mxu1 %v627_v50  ;;  %v403_v49 = vld [vmem:[%s2513_s11 + $0x1b8] sm:$0xff]  ;;  %v696_v50 = vunpack.c.h.s8.bf16 %v392_v41  ;;  %v705_v52 = vunpack.c.l.s8.bf16 %v401_v48  ;;  %v713_v59 = vunpack.c.h.s8.bf16 %v401_v48 }
 0x257   : > { %1449 = vmatpush1.bf16.msra.mxu0 %v624_v53  ;;  %1613 = vmatpush1.bf16.msra.mxu1 %v626_v54  ;;  %v707_v53 = vunpack.c.l.s8.bf16 %v403_v49  ;;  %v400_v54 = vld [vmem:[%s2513_s11 + $0x1a0] sm:$0xff] }
 0x258   : > { %1450 = vmatprep.subr.bf16.mxu0 %v633_v55  ;;  %1614 = vmatprep.subr.bf16.mxu1 %v635_v57  ;;  %v402_v55 = vld [vmem:[%s2513_s11 + $0x1b0] sm:$0xff]  ;;  %v704_v57 = vunpack.c.l.s8.bf16 %v400_v54 }
 0x259   : > { %v706_v58 = vunpack.c.l.s8.bf16 %v402_v55  ;;  %v714_v63 = vunpack.c.h.s8.bf16 %v402_v55  ;;  %v440_v55 = vld [vmem:[%s2513_s11 + $0x2e0] sm:$0xff] }
 0x25b   : > { %1451 = vmatpush1.bf16.msra.mxu0 %v632_v60  ;;  %1615 = vmatpush1.bf16.msra.mxu1 %v634_v61  ;;  %v715_v60 = vunpack.c.h.s8.bf16 %v403_v49  ;;  %v409_v61 = vld [vmem:[%s2513_s11 + $0x1e8] sm:$0xff] }
 0x25c   : > { %1452 = vmatprep.subr.bf16.mxu0 %v641_v30  ;;  %1616 = vmatprep.subr.bf16.mxu1 %v643_v62  ;;  %v411_v30 = vld [vmem:[%s2513_s11 + $0x1f8] sm:$0xff]  ;;  %v712_v62 = vunpack.c.h.s8.bf16 %v400_v54  ;;  %v721_v1 = vunpack.c.l.s8.bf16 %v409_v61  ;;  %v729_v7 = vunpack.c.h.s8.bf16 %v409_v61  ;;  %v441_v49 = vld [vmem:[%s2513_s11 + $0x2e8] sm:$0xff] }
 0x25f   : > { %1453 = vmatpush1.bf16.msra.mxu0 %v640_v2  ;;  %1617 = vmatpush1.bf16.msra.mxu1 %v642_v3  ;;  %v723_v2 = vunpack.c.l.s8.bf16 %v411_v30  ;;  %v408_v3 = vld [vmem:[%s2513_s11 + $0x1e0] sm:$0xff] }
 0x260   : > { %1454 = vmatprep.subr.bf16.mxu0 %v649_v4  ;;  %1618 = vmatprep.subr.bf16.mxu1 %v651_v5  ;;  %v410_v4 = vld [vmem:[%s2513_s11 + $0x1f0] sm:$0xff]  ;;  %v720_v5 = vunpack.c.l.s8.bf16 %v408_v3 }
 0x261   : > { %v722_v6 = vunpack.c.l.s8.bf16 %v410_v4  ;;  %v730_v13 = vunpack.c.h.s8.bf16 %v410_v4  ;;  %v448_v4 = vld [vmem:[%s2513_s11 + $0x320] sm:$0xff] }
 0x263   : > { %1455 = vmatpush1.bf16.msra.mxu0 %v648_v8  ;;  %1619 = vmatpush1.bf16.msra.mxu1 %v650_v9  ;;  %v731_v8 = vunpack.c.h.s8.bf16 %v411_v30  ;;  %v417_v9 = vld [vmem:[%s2513_s11 + $0x228] sm:$0xff] }
 0x264   : > { %1456 = vmatprep.subr.bf16.mxu0 %v657_v10  ;;  %1620 = vmatprep.subr.bf16.mxu1 %v659_v11  ;;  %v419_v10 = vld [vmem:[%s2513_s11 + $0x238] sm:$0xff]  ;;  %v728_v11 = vunpack.c.h.s8.bf16 %v408_v3  ;;  %v737_v14 = vunpack.c.l.s8.bf16 %v417_v9  ;;  %v745_v21 = vunpack.c.h.s8.bf16 %v417_v9  ;;  %v449_v30 = vld [vmem:[%s2513_s11 + $0x328] sm:$0xff] }
 0x267   : > { %1457 = vmatpush1.bf16.msra.mxu0 %v656_v15  ;;  %1621 = vmatpush1.bf16.msra.mxu1 %v658_v16  ;;  %v739_v15 = vunpack.c.l.s8.bf16 %v419_v10  ;;  %v416_v16 = vld [vmem:[%s2513_s11 + $0x220] sm:$0xff] }
 0x268   : > { %1458 = vmatprep.subr.bf16.mxu0 %v665_v17  ;;  %1622 = vmatprep.subr.bf16.mxu1 %v667_v18  ;;  %v418_v17 = vld [vmem:[%s2513_s11 + $0x230] sm:$0xff]  ;;  %v736_v18 = vunpack.c.l.s8.bf16 %v416_v16 }
 0x269   : > { %v738_v19 = vunpack.c.l.s8.bf16 %v418_v17  ;;  %v746_v26 = vunpack.c.h.s8.bf16 %v418_v17  ;;  %v456_v17 = vld [vmem:[%s2513_s11 + $0x360] sm:$0xff] }
 0x26b   : > { %1459 = vmatpush1.bf16.msra.mxu0 %v664_v22  ;;  %1623 = vmatpush1.bf16.msra.mxu1 %v666_v23  ;;  %v747_v22 = vunpack.c.h.s8.bf16 %v419_v10  ;;  %v425_v23 = vld [vmem:[%s2513_s11 + $0x268] sm:$0xff] }
 0x26c   : > { %1460 = vmatprep.subr.bf16.mxu0 %v673_v24  ;;  %1624 = vmatprep.subr.bf16.mxu1 %v675_v25  ;;  %v427_v24 = vld [vmem:[%s2513_s11 + $0x278] sm:$0xff]  ;;  %v744_v25 = vunpack.c.h.s8.bf16 %v416_v16  ;;  %v753_v27 = vunpack.c.l.s8.bf16 %v425_v23  ;;  %v761_v33 = vunpack.c.h.s8.bf16 %v425_v23  ;;  %v457_v10 = vld [vmem:[%s2513_s11 + $0x368] sm:$0xff] }
 0x26d   : > { %v763_v34 = vunpack.c.h.s8.bf16 %v427_v24 }
 0x26f   : > { %1461 = vmatpush1.bf16.msra.mxu0 %v672_v28  ;;  %1625 = vmatpush1.bf16.msra.mxu1 %v674_v29  ;;  %v755_v28 = vunpack.c.l.s8.bf16 %v427_v24  ;;  %v424_v29 = vld [vmem:[%s2513_s11 + $0x260] sm:$0xff]  ;;  %v465_v24 = vld [vmem:[%s2513_s11 + $0x3a8] sm:$0xff] }
 0x270   : > { %1462 = vmatprep.subr.bf16.mxu0 %v681_v31  ;;  %1626 = vmatprep.subr.bf16.mxu1 %v683_v32  ;;  %v426_v31 = vld [vmem:[%s2513_s11 + $0x270] sm:$0xff]  ;;  %v752_v32 = vunpack.c.l.s8.bf16 %v424_v29 }
 0x273   : > { %1463 = vmatpush1.bf16.msra.mxu0 %v680_v35  ;;  %1627 = vmatpush1.bf16.msra.mxu1 %v682_v36  ;;  %v433_v35 = vld [vmem:[%s2513_s11 + $0x2a8] sm:$0xff]  ;;  %v435_v36 = vld [vmem:[%s2513_s11 + $0x2b8] sm:$0xff] }
 0x274   : > { %1464 = vmatprep.subr.bf16.mxu0 %v689_v38  ;;  %1628 = vmatprep.subr.bf16.mxu1 %v691_v40  ;;  %v760_v38 = vunpack.c.h.s8.bf16 %v424_v29  ;;  %v762_v40 = vunpack.c.h.s8.bf16 %v426_v31  ;;  %v771_v41 = vunpack.c.l.s8.bf16 %v435_v36  ;;  %v779_v48 = vunpack.c.h.s8.bf16 %v435_v36  ;;  %v473_v36 = vld [vmem:[%s2513_s11 + $0x3e8] sm:$0xff] }
 0x277   : > { %1465 = vmatpush1.bf16.msra.mxu0 %v688_v43  ;;  %1629 = vmatpush1.bf16.msra.mxu1 %v690_v44  ;;  %v434_v43 = vld [vmem:[%s2513_s11 + $0x2b0] sm:$0xff]  ;;  %v768_v44 = vunpack.c.l.s8.bf16 %v432_v42 }
 0x278   : > { %1466 = vmatprep.subr.bf16.mxu0 %v697_v46  ;;  %1630 = vmatprep.subr.bf16.mxu1 %v699_v47  ;;  %v770_v46 = vunpack.c.l.s8.bf16 %v434_v43  ;;  %v777_v47 = vunpack.c.h.s8.bf16 %v433_v35 }
 0x27b   : > { %1467 = vmatpush1.bf16.msra.mxu0 %v696_v50  ;;  %1631 = vmatpush1.bf16.msra.mxu1 %v698_v51  ;;  %v443_v50 = vld [vmem:[%s2513_s11 + $0x2f8] sm:$0xff]  ;;  %v776_v51 = vunpack.c.h.s8.bf16 %v432_v42 }
 0x27c   : > { %1468 = vmatprep.subr.bf16.mxu0 %v705_v52  ;;  %1632 = vmatprep.subr.bf16.mxu1 %v707_v53  ;;  %v778_v52 = vunpack.c.h.s8.bf16 %v434_v43  ;;  %v785_v53 = vunpack.c.l.s8.bf16 %v441_v49  ;;  %v787_v54 = vunpack.c.l.s8.bf16 %v443_v50  ;;  %v795_v61 = vunpack.c.h.s8.bf16 %v443_v50  ;;  %v472_v43 = vld [vmem:[%s2513_s11 + $0x3e0] sm:$0xff]  ;;  %v481_v50 = vld [vmem:[%s2513_s11 + $0x428] sm:$0xff] }
 0x27f   : > { %1469 = vmatpush1.bf16.msra.mxu0 %v704_v57  ;;  %1633 = vmatpush1.bf16.msra.mxu1 %v706_v58  ;;  %v442_v57 = vld [vmem:[%s2513_s11 + $0x2f0] sm:$0xff]  ;;  %v784_v58 = vunpack.c.l.s8.bf16 %v440_v55 }
 0x280   : > { %1470 = vmatprep.subr.bf16.mxu0 %v713_v59  ;;  %1634 = vmatprep.subr.bf16.mxu1 %v715_v60  ;;  %v786_v59 = vunpack.c.l.s8.bf16 %v442_v57  ;;  %v793_v60 = vunpack.c.h.s8.bf16 %v441_v49 }
 0x283   : > { %1471 = vmatpush1.bf16.msra.mxu0 %v712_v62  ;;  %1635 = vmatpush1.bf16.msra.mxu1 %v714_v63  ;;  %v451_v62 = vld [vmem:[%s2513_s11 + $0x338] sm:$0xff]  ;;  %v792_v63 = vunpack.c.h.s8.bf16 %v440_v55 }
 0x284   : > { %1472 = vmatprep.subr.bf16.mxu0 %v721_v1  ;;  %1636 = vmatprep.subr.bf16.mxu1 %v723_v2  ;;  %v794_v1 = vunpack.c.h.s8.bf16 %v442_v57  ;;  %v801_v2 = vunpack.c.l.s8.bf16 %v449_v30  ;;  %v803_v3 = vunpack.c.l.s8.bf16 %v451_v62  ;;  %v811_v9 = vunpack.c.h.s8.bf16 %v451_v62  ;;  %v480_v57 = vld [vmem:[%s2513_s11 + $0x420] sm:$0xff]  ;;  %v489_v62 = vld [vmem:[%s2513_s11 + $0x468] sm:$0xff] }
 0x287   : > { %1473 = vmatpush1.bf16.msra.mxu0 %v720_v5  ;;  %1637 = vmatpush1.bf16.msra.mxu1 %v722_v6  ;;  %v450_v5 = vld [vmem:[%s2513_s11 + $0x330] sm:$0xff]  ;;  %v800_v6 = vunpack.c.l.s8.bf16 %v448_v4 }
 0x288   : > { %1474 = vmatprep.subr.bf16.mxu0 %v729_v7  ;;  %1638 = vmatprep.subr.bf16.mxu1 %v731_v8  ;;  %v802_v7 = vunpack.c.l.s8.bf16 %v450_v5  ;;  %v809_v8 = vunpack.c.h.s8.bf16 %v449_v30 }
 0x28b   : > { %1475 = vmatpush1.bf16.msra.mxu0 %v728_v11  ;;  %1639 = vmatpush1.bf16.msra.mxu1 %v730_v13  ;;  %v459_v11 = vld [vmem:[%s2513_s11 + $0x378] sm:$0xff]  ;;  %v808_v13 = vunpack.c.h.s8.bf16 %v448_v4 }
 0x28c   : > { %1485 = vmatprep.subr.bf16.mxu0 %v737_v14  ;;  %1649 = vmatprep.subr.bf16.mxu1 %v739_v15  ;;  %v810_v14 = vunpack.c.h.s8.bf16 %v450_v5  ;;  %v817_v15 = vunpack.c.l.s8.bf16 %v457_v10  ;;  %v819_v16 = vunpack.c.l.s8.bf16 %v459_v11  ;;  %v827_v23 = vunpack.c.h.s8.bf16 %v459_v11  ;;  %v488_v5 = vld [vmem:[%s2513_s11 + $0x460] sm:$0xff]  ;;  %v499_v11 = vld [vmem:[%s2513_s11 + $0x4b8] sm:$0xff] }
 0x28e   : > { %1477 = vmatmul.mubr.bf16.vlgmr.msra.gmra.mrb[4].mxu0 %v2599_v37  ;;  %1641 = vmatmul.mubr.bf16.vlgmr.msra.gmra.mrb[4].mxu1 %v2599_v37  ;;  %v754_v37 = vunpack.c.l.s8.bf16 %v426_v31  ;;  %v464_v31 = vld [vmem:[%s2513_s11 + $0x3a0] sm:$0xff] }
 0x28f   : > { %1486 = vmatpush1.bf16.msra.mxu0 %v736_v18  ;;  %1650 = vmatpush1.bf16.msra.mxu1 %v738_v19  ;;  %v458_v18 = vld [vmem:[%s2513_s11 + $0x370] sm:$0xff]  ;;  %v816_v19 = vunpack.c.l.s8.bf16 %v456_v17 }
 0x290   : > { %1487 = vmatprep.subr.bf16.mxu0 %v745_v21  ;;  %1651 = vmatprep.subr.bf16.mxu1 %v747_v22  ;;  %v818_v21 = vunpack.c.l.s8.bf16 %v458_v18  ;;  %v825_v22 = vunpack.c.h.s8.bf16 %v457_v10  ;;  %v497_v10 = vld [vmem:[%s2513_s11 + $0x4a8] sm:$0xff] }
 0x291   : > { %1517 = vmatprep.mubr.bf16.mxu0 %v2606_v45  ;;  %1681 = vmatprep.mubr.bf16.mxu1 %v2606_v45  ;;  %v769_v45 = vunpack.c.l.s8.bf16 %v433_v35 }
 0x293   : > { %1488 = vmatpush1.bf16.msra.mxu0 %v744_v25  ;;  %1652 = vmatpush1.bf16.msra.mxu1 %v746_v26  ;;  %v467_v25 = vld [vmem:[%s2513_s11 + $0x3b8] sm:$0xff]  ;;  %v824_v26 = vunpack.c.h.s8.bf16 %v456_v17  ;;  %v498_v17 = vld [vmem:[%s2513_s11 + $0x4b0] sm:$0xff] }
 0x294   : > { %1489 = vmatprep.subr.bf16.mxu0 %v753_v27  ;;  %1653 = vmatprep.subr.bf16.mxu1 %v755_v28  ;;  %v826_v27 = vunpack.c.h.s8.bf16 %v458_v18  ;;  %v833_v28 = vunpack.c.l.s8.bf16 %v465_v24  ;;  %v835_v29 = vunpack.c.l.s8.bf16 %v467_v25  ;;  %v843_v35 = vunpack.c.h.s8.bf16 %v467_v25 }
 0x297   : > { %1490 = vmatpush1.bf16.msra.mxu0 %v752_v32  ;;  %1654 = vmatpush1.bf16.msra.mxu1 %v754_v37  ;;  %v466_v32 = vld [vmem:[%s2513_s11 + $0x3b0] sm:$0xff]  ;;  %v832_v37 = vunpack.c.l.s8.bf16 %v464_v31 }
 0x298   : > { %1491 = vmatprep.subr.bf16.mxu0 %v761_v33  ;;  %1655 = vmatprep.subr.bf16.mxu1 %v763_v34  ;;  %v834_v33 = vunpack.c.l.s8.bf16 %v466_v32  ;;  %v841_v34 = vunpack.c.h.s8.bf16 %v465_v24  ;;  %v507_v24 = vld [vmem:[%s2513_s11 + $0x4f8] sm:$0xff] }
 0x29b   : > { %1492 = vmatpush1.bf16.msra.mxu0 %v760_v38  ;;  %1656 = vmatpush1.bf16.msra.mxu1 %v762_v40  ;;  %v475_v38 = vld [vmem:[%s2513_s11 + $0x3f8] sm:$0xff]  ;;  %v840_v40 = vunpack.c.h.s8.bf16 %v464_v31  ;;  %v506_v31 = vld [vmem:[%s2513_s11 + $0x4f0] sm:$0xff] }
 0x29c   : > { %1493 = vmatprep.subr.bf16.mxu0 %v769_v45  ;;  %1657 = vmatprep.subr.bf16.mxu1 %v771_v41  ;;  %v842_v45 = vunpack.c.h.s8.bf16 %v466_v32  ;;  %v849_v41 = vunpack.c.l.s8.bf16 %v473_v36  ;;  %v851_v42 = vunpack.c.l.s8.bf16 %v475_v38  ;;  %v859_v49 = vunpack.c.h.s8.bf16 %v475_v38 }
 0x29f   : > { %1494 = vmatpush1.bf16.msra.mxu0 %v768_v44  ;;  %1658 = vmatpush1.bf16.msra.mxu1 %v770_v46  ;;  %v474_v44 = vld [vmem:[%s2513_s11 + $0x3f0] sm:$0xff]  ;;  %v848_v46 = vunpack.c.l.s8.bf16 %v472_v43 }
 0x2a0   : > { %1495 = vmatprep.subr.bf16.mxu0 %v777_v47  ;;  %1659 = vmatprep.subr.bf16.mxu1 %v779_v48  ;;  %v850_v47 = vunpack.c.l.s8.bf16 %v474_v44  ;;  %v857_v48 = vunpack.c.h.s8.bf16 %v473_v36  ;;  %v515_v36 = vld [vmem:[%s2513_s11 + $0x538] sm:$0xff] }
 0x2a3   : > { %1496 = vmatpush1.bf16.msra.mxu0 %v776_v51  ;;  %1660 = vmatpush1.bf16.msra.mxu1 %v778_v52  ;;  %v483_v51 = vld [vmem:[%s2513_s11 + $0x438] sm:$0xff]  ;;  %v856_v52 = vunpack.c.h.s8.bf16 %v472_v43  ;;  %v514_v43 = vld [vmem:[%s2513_s11 + $0x530] sm:$0xff] }
 0x2a4   : > { %1497 = vmatprep.subr.bf16.mxu0 %v785_v53  ;;  %1661 = vmatprep.subr.bf16.mxu1 %v787_v54  ;;  %v858_v53 = vunpack.c.h.s8.bf16 %v474_v44  ;;  %v865_v54 = vunpack.c.l.s8.bf16 %v481_v50  ;;  %v867_v55 = vunpack.c.l.s8.bf16 %v483_v51  ;;  %v875_v30 = vunpack.c.h.s8.bf16 %v483_v51 }
 0x2a7   : > { %1498 = vmatpush1.bf16.msra.mxu0 %v784_v58  ;;  %1662 = vmatpush1.bf16.msra.mxu1 %v786_v59  ;;  %v482_v58 = vld [vmem:[%s2513_s11 + $0x430] sm:$0xff]  ;;  %v864_v59 = vunpack.c.l.s8.bf16 %v480_v57 }
 0x2a8   : > { %1499 = vmatprep.subr.bf16.mxu0 %v793_v60  ;;  %1663 = vmatprep.subr.bf16.mxu1 %v795_v61  ;;  %v866_v60 = vunpack.c.l.s8.bf16 %v482_v58  ;;  %v873_v61 = vunpack.c.h.s8.bf16 %v481_v50  ;;  %v523_v50 = vld [vmem:[%s2513_s11 + $0x578] sm:$0xff] }
 0x2ab   : > { %1500 = vmatpush1.bf16.msra.mxu0 %v792_v63  ;;  %1664 = vmatpush1.bf16.msra.mxu1 %v794_v1  ;;  %v491_v63 = vld [vmem:[%s2513_s11 + $0x478] sm:$0xff]  ;;  %v872_v1 = vunpack.c.h.s8.bf16 %v480_v57  ;;  %v522_v57 = vld [vmem:[%s2513_s11 + $0x570] sm:$0xff] }
 0x2ac   : > { %1501 = vmatprep.subr.bf16.mxu0 %v801_v2  ;;  %1665 = vmatprep.subr.bf16.mxu1 %v803_v3  ;;  %v874_v2 = vunpack.c.h.s8.bf16 %v482_v58  ;;  %v881_v3 = vunpack.c.l.s8.bf16 %v489_v62  ;;  %v883_v4 = vunpack.c.l.s8.bf16 %v491_v63 }
 0x2af   : > { %1502 = vmatpush1.bf16.msra.mxu0 %v800_v6  ;;  %1666 = vmatpush1.bf16.msra.mxu1 %v802_v7  ;;  %v490_v6 = vld [vmem:[%s2513_s11 + $0x470] sm:$0xff]  ;;  %v880_v7 = vunpack.c.l.s8.bf16 %v488_v5 }
 0x2b0   : > { %1503 = vmatprep.subr.bf16.mxu0 %v809_v8  ;;  %1667 = vmatprep.subr.bf16.mxu1 %v811_v9  ;;  %v889_v8 = vunpack.c.h.s8.bf16 %v489_v62  ;;  %v891_v9 = vunpack.c.h.s8.bf16 %v491_v63  ;;  %v531_v62 = vld [vmem:[%s2513_s11 + $0x5b8] sm:$0xff] }
 0x2b3   : > { %1504 = vmatpush1.bf16.msra.mxu0 %v808_v13  ;;  %1668 = vmatpush1.bf16.msra.mxu1 %v810_v14  ;;  %v888_v13 = vunpack.c.h.s8.bf16 %v488_v5  ;;  %v890_v14 = vunpack.c.h.s8.bf16 %v490_v6  ;;  %v530_v5 = vld [vmem:[%s2513_s11 + $0x5b0] sm:$0xff] }
 0x2b4   : > { %1505 = vmatprep.subr.bf16.mxu0 %v817_v15  ;;  %1669 = vmatprep.subr.bf16.mxu1 %v819_v16  ;;  %v899_v15 = vunpack.c.l.s8.bf16 %v499_v11  ;;  %v496_v16 = vld [vmem:[%s2513_s11 + $0x4a0] sm:$0xff] }
 0x2b5   : > { %v896_v18 = vunpack.c.l.s8.bf16 %v496_v16  ;;  %v904_v25 = vunpack.c.h.s8.bf16 %v496_v16  ;;  %v538_v16 = vld [vmem:[%s2513_s11 + $0x5f0] sm:$0xff] }
 0x2b7   : > { %1506 = vmatpush1.bf16.msra.mxu0 %v816_v19  ;;  %1670 = vmatpush1.bf16.msra.mxu1 %v818_v21  ;;  %v898_v19 = vunpack.c.l.s8.bf16 %v498_v17  ;;  %v905_v21 = vunpack.c.h.s8.bf16 %v497_v10 }
 0x2b8   : > { %1507 = vmatprep.subr.bf16.mxu0 %v825_v22  ;;  %1671 = vmatprep.subr.bf16.mxu1 %v827_v23  ;;  %v907_v22 = vunpack.c.h.s8.bf16 %v499_v11  ;;  %v505_v23 = vld [vmem:[%s2513_s11 + $0x4e8] sm:$0xff] }
 0x2bb   : > { %1508 = vmatpush1.bf16.msra.mxu0 %v824_v26  ;;  %1672 = vmatpush1.bf16.msra.mxu1 %v826_v27  ;;  %v906_v26 = vunpack.c.h.s8.bf16 %v498_v17  ;;  %v913_v27 = vunpack.c.l.s8.bf16 %v505_v23 }
 0x2bc   : > { %1509 = vmatprep.subr.bf16.mxu0 %v833_v28  ;;  %1673 = vmatprep.subr.bf16.mxu1 %v835_v29  ;;  %v915_v28 = vunpack.c.l.s8.bf16 %v507_v24  ;;  %v504_v29 = vld [vmem:[%s2513_s11 + $0x4e0] sm:$0xff] }
 0x2bd   : > { %v912_v32 = vunpack.c.l.s8.bf16 %v504_v29  ;;  %v920_v38 = vunpack.c.h.s8.bf16 %v504_v29  ;;  %v546_v29 = vld [vmem:[%s2513_s11 + $0x630] sm:$0xff] }
 0x2bf   : > { %1510 = vmatpush1.bf16.msra.mxu0 %v832_v37  ;;  %1674 = vmatpush1.bf16.msra.mxu1 %v834_v33  ;;  %v914_v37 = vunpack.c.l.s8.bf16 %v506_v31  ;;  %v921_v33 = vunpack.c.h.s8.bf16 %v505_v23  ;;  %v547_v23 = vld [vmem:[%s2513_s11 + $0x638] sm:$0xff] }
 0x2c0   : > { %1511 = vmatprep.subr.bf16.mxu0 %v841_v34  ;;  %1675 = vmatprep.subr.bf16.mxu1 %v843_v35  ;;  %v923_v34 = vunpack.c.h.s8.bf16 %v507_v24  ;;  %v513_v35 = vld [vmem:[%s2513_s11 + $0x528] sm:$0xff] }
 0x2c3   : > { %1512 = vmatpush1.bf16.msra.mxu0 %v840_v40  ;;  %1676 = vmatpush1.bf16.msra.mxu1 %v842_v45  ;;  %v922_v40 = vunpack.c.h.s8.bf16 %v506_v31  ;;  %v929_v45 = vunpack.c.l.s8.bf16 %v513_v35 }
 0x2c4   : > { %1513 = vmatprep.subr.bf16.mxu0 %v849_v41  ;;  %1677 = vmatprep.subr.bf16.mxu1 %v851_v42  ;;  %v931_v41 = vunpack.c.l.s8.bf16 %v515_v36  ;;  %v512_v42 = vld [vmem:[%s2513_s11 + $0x520] sm:$0xff] }
 0x2c5   : > { %v928_v44 = vunpack.c.l.s8.bf16 %v512_v42  ;;  %v936_v51 = vunpack.c.h.s8.bf16 %v512_v42  ;;  %v554_v42 = vld [vmem:[%s2513_s11 + $0x670] sm:$0xff] }
 0x2c7   : > { %1514 = vmatpush1.bf16.msra.mxu0 %v848_v46  ;;  %1678 = vmatpush1.bf16.msra.mxu1 %v850_v47  ;;  %v930_v46 = vunpack.c.l.s8.bf16 %v514_v43  ;;  %v937_v47 = vunpack.c.h.s8.bf16 %v513_v35  ;;  %v555_v35 = vld [vmem:[%s2513_s11 + $0x678] sm:$0xff] }
 0x2c8   : > { %1515 = vmatprep.subr.bf16.mxu0 %v857_v48  ;;  %1679 = vmatprep.subr.bf16.mxu1 %v859_v49  ;;  %v939_v48 = vunpack.c.h.s8.bf16 %v515_v36  ;;  %v521_v49 = vld [vmem:[%s2513_s11 + $0x568] sm:$0xff] }
 0x2cb   : > { %1516 = vmatpush1.bf16.msra.mxu0 %v856_v52  ;;  %1680 = vmatpush1.bf16.msra.mxu1 %v858_v53  ;;  %v938_v52 = vunpack.c.h.s8.bf16 %v514_v43  ;;  %v945_v53 = vunpack.c.l.s8.bf16 %v521_v49  ;;  %v1776_v43 = vlaneseq }
 0x2cc   : > { %1526 = vmatprep.subr.bf16.mxu0 %v865_v54  ;;  %1690 = vmatprep.subr.bf16.mxu1 %v867_v55  ;;  %v947_v54 = vunpack.c.l.s8.bf16 %v523_v50  ;;  %v520_v55 = vld [vmem:[%s2513_s11 + $0x560] sm:$0xff] }
 0x2cd   : > { %v944_v58 = vunpack.c.l.s8.bf16 %v520_v55  ;;  %v952_v63 = vunpack.c.h.s8.bf16 %v520_v55  ;;  %v562_v55 = vld [vmem:[%s2513_s11 + $0x6b0] sm:$0xff] }
 0x2ce   : > { %1518 = vmatmul.mubr.bf16.vlgmr.msra.gmra.mrb[4].mxu0 %v2645_v12  ;;  %1682 = vmatmul.mubr.bf16.vlgmr.msra.gmra.mrb[4].mxu1 %v2645_v12  ;;  %v882_v12 = vunpack.c.l.s8.bf16 %v490_v6 }
 0x2cf   : > { %1527 = vmatpush1.bf16.msra.mxu0 %v864_v59  ;;  %1691 = vmatpush1.bf16.msra.mxu1 %v866_v60  ;;  %v946_v59 = vunpack.c.l.s8.bf16 %v522_v57  ;;  %v953_v60 = vunpack.c.h.s8.bf16 %v521_v49  ;;  %v563_v49 = vld [vmem:[%s2513_s11 + $0x6b8] sm:$0xff] }
 0x2d0   : > { %1528 = vmatprep.subr.bf16.mxu0 %v873_v61  ;;  %1692 = vmatprep.subr.bf16.mxu1 %v875_v30  ;;  %v955_v61 = vunpack.c.h.s8.bf16 %v523_v50  ;;  %v529_v30 = vld [vmem:[%s2513_s11 + $0x5a8] sm:$0xff]  ;;  %v2858_v50 = vshrl.u32 %v1776_v43, 7 }
 0x2d1   : > { %1558 = vmatprep.mubr.bf16.mxu0 %v2652_v20  ;;  %1722 = vmatprep.mubr.bf16.mxu1 %v2652_v20  ;;  %v897_v20 = vunpack.c.l.s8.bf16 %v497_v10  ;;  %v539_v10 = vld [vmem:[%s2513_s11 + $0x5f8] sm:$0xff] }
 0x2d3   : > { %1529 = vmatpush1.bf16.msra.mxu0 %v872_v1  ;;  %1693 = vmatpush1.bf16.msra.mxu1 %v874_v2  ;;  %v954_v1 = vunpack.c.h.s8.bf16 %v522_v57  ;;  %v961_v2 = vunpack.c.l.s8.bf16 %v529_v30  ;;  %v1778_v57 = vsub.s32 0, %v2858_v50 }
 0x2d4   : > { %1530 = vmatprep.subr.bf16.mxu0 %v881_v3  ;;  %1694 = vmatprep.subr.bf16.mxu1 %v883_v4  ;;  %v963_v3 = vunpack.c.l.s8.bf16 %v531_v62  ;;  %v528_v4 = vld [vmem:[%s2513_s11 + $0x5a0] sm:$0xff] }
 0x2d5   : > { %v960_v6 = vunpack.c.l.s8.bf16 %v528_v4  ;;  %v968_v11 = vunpack.c.h.s8.bf16 %v528_v4  ;;  %v571_v4 = vld [vmem:[%s2513_s11 + $0x6f8] sm:$0xff] }
 0x2d7   : > { %1531 = vmatpush1.bf16.msra.mxu0 %v880_v7  ;;  %1695 = vmatpush1.bf16.msra.mxu1 %v882_v12  ;;  %v962_v7 = vunpack.c.l.s8.bf16 %v530_v5  ;;  %v969_v12 = vunpack.c.h.s8.bf16 %v529_v30  ;;  %v1782_v30 = vsub.s32 1, %v2858_v50 }
 0x2d8   : > { %1532 = vmatprep.subr.bf16.mxu0 %v889_v8  ;;  %1696 = vmatprep.subr.bf16.mxu1 %v891_v9  ;;  %v971_v8 = vunpack.c.h.s8.bf16 %v531_v62  ;;  %v537_v9 = vld [vmem:[%s2513_s11 + $0x5e8] sm:$0xff]  ;;  %v1790_v62 = vsub.s32 3, %v2858_v50 }
 0x2db   : > { %1533 = vmatpush1.bf16.msra.mxu0 %v888_v13  ;;  %1697 = vmatpush1.bf16.msra.mxu1 %v890_v14  ;;  %v970_v13 = vunpack.c.h.s8.bf16 %v530_v5  ;;  %v977_v14 = vunpack.c.l.s8.bf16 %v537_v9 }
 0x2dc   : > { %1534 = vmatprep.subr.bf16.mxu0 %v897_v20  ;;  %1698 = vmatprep.subr.bf16.mxu1 %v899_v15  ;;  %v979_v20 = vunpack.c.l.s8.bf16 %v539_v10  ;;  %v536_v15 = vld [vmem:[%s2513_s11 + $0x5e0] sm:$0xff] }
 0x2dd   : > { %v976_v17 = vunpack.c.l.s8.bf16 %v536_v15  ;;  %v984_v24 = vunpack.c.h.s8.bf16 %v536_v15  ;;  %v570_v15 = vld [vmem:[%s2513_s11 + $0x6f0] sm:$0xff] }
 0x2de   : > { %v1050_v43 = vunpack.c.h.s8.bf16 %v570_v15 }
 0x2df   : > { %1535 = vmatpush1.bf16.msra.mxu0 %v896_v18  ;;  %1699 = vmatpush1.bf16.msra.mxu1 %v898_v19  ;;  %v978_v18 = vunpack.c.l.s8.bf16 %v538_v16  ;;  %v985_v19 = vunpack.c.h.s8.bf16 %v537_v9  ;;  %v1034_v9 = vunpack.c.h.s8.bf16 %v562_v55 }
 0x2e0   : > { %1536 = vmatprep.subr.bf16.mxu0 %v905_v21  ;;  %1700 = vmatprep.subr.bf16.mxu1 %v907_v22  ;;  %v987_v21 = vunpack.c.h.s8.bf16 %v539_v10  ;;  %v545_v22 = vld [vmem:[%s2513_s11 + $0x628] sm:$0xff] }
 0x2e3   : > { %1537 = vmatpush1.bf16.msra.mxu0 %v904_v25  ;;  %1701 = vmatpush1.bf16.msra.mxu1 %v906_v26  ;;  %v986_v25 = vunpack.c.h.s8.bf16 %v538_v16  ;;  %v993_v26 = vunpack.c.l.s8.bf16 %v545_v22 }
 0x2e4   : > { %1538 = vmatprep.subr.bf16.mxu0 %v913_v27  ;;  %1702 = vmatprep.subr.bf16.mxu1 %v915_v28  ;;  %v995_v27 = vunpack.c.l.s8.bf16 %v547_v23  ;;  %v544_v28 = vld [vmem:[%s2513_s11 + $0x620] sm:$0xff] }
 0x2e5   : > { %v992_v31 = vunpack.c.l.s8.bf16 %v544_v28  ;;  %v1000_v36 = vunpack.c.h.s8.bf16 %v544_v28 }
 0x2e7   : > { %1539 = vmatpush1.bf16.msra.mxu0 %v912_v32  ;;  %1703 = vmatpush1.bf16.msra.mxu1 %v914_v37  ;;  %v994_v32 = vunpack.c.l.s8.bf16 %v546_v29  ;;  %v1001_v37 = vunpack.c.h.s8.bf16 %v545_v22 }
 0x2e8   : > { %1540 = vmatprep.subr.bf16.mxu0 %v921_v33  ;;  %1704 = vmatprep.subr.bf16.mxu1 %v923_v34  ;;  %v1003_v33 = vunpack.c.h.s8.bf16 %v547_v23  ;;  %v553_v34 = vld [vmem:[%s2513_s11 + $0x668] sm:$0xff] }
 0x2eb   : > { %1541 = vmatpush1.bf16.msra.mxu0 %v920_v38  ;;  %1705 = vmatpush1.bf16.msra.mxu1 %v922_v40  ;;  %v1002_v38 = vunpack.c.h.s8.bf16 %v546_v29  ;;  %v1009_v40 = vunpack.c.l.s8.bf16 %v553_v34 }
 0x2ec   : > { %1542 = vmatprep.subr.bf16.mxu0 %v929_v45  ;;  %1706 = vmatprep.subr.bf16.mxu1 %v931_v41  ;;  %v1011_v45 = vunpack.c.l.s8.bf16 %v555_v35  ;;  %v552_v41 = vld [vmem:[%s2513_s11 + $0x660] sm:$0xff] }
 0x2ef   : > { %1543 = vmatpush1.bf16.msra.mxu0 %v928_v44  ;;  %1707 = vmatpush1.bf16.msra.mxu1 %v930_v46  ;;  %v1010_v44 = vunpack.c.l.s8.bf16 %v554_v42  ;;  %v1017_v46 = vunpack.c.h.s8.bf16 %v553_v34 }
 0x2f0   : > { %1544 = vmatprep.subr.bf16.mxu0 %v937_v47  ;;  %1708 = vmatprep.subr.bf16.mxu1 %v939_v48  ;;  %v1019_v47 = vunpack.c.h.s8.bf16 %v555_v35  ;;  %v561_v48 = vld [vmem:[%s2513_s11 + $0x6a8] sm:$0xff] }
 0x2f3   : > { %1545 = vmatpush1.bf16.msra.mxu0 %v936_v51  ;;  %1709 = vmatpush1.bf16.msra.mxu1 %v938_v52  ;;  %v1016_v51 = vunpack.c.h.s8.bf16 %v552_v41  ;;  %v1025_v52 = vunpack.c.l.s8.bf16 %v561_v48 }
 0x2f4   : > { %1546 = vmatprep.subr.bf16.mxu0 %v945_v53  ;;  %1710 = vmatprep.subr.bf16.mxu1 %v947_v54  ;;  %v1027_v53 = vunpack.c.l.s8.bf16 %v563_v49  ;;  %v560_v54 = vld [vmem:[%s2513_s11 + $0x6a0] sm:$0xff] }
 0x2f7   : > { %1547 = vmatpush1.bf16.msra.mxu0 %v944_v58  ;;  %1711 = vmatpush1.bf16.msra.mxu1 %v946_v59  ;;  %v1786_v58 = vsub.s32 2, %v2858_v50  ;;  %v1024_v59 = vunpack.c.l.s8.bf16 %v560_v54 }
 0x2f8   : > { %1548 = vmatprep.subr.bf16.mxu0 %v953_v60  ;;  %1712 = vmatprep.subr.bf16.mxu1 %v955_v61  ;;  %v1026_v60 = vunpack.c.l.s8.bf16 %v562_v55  ;;  %v2864_v61 = vld [vmem:[%s1773_s27] sm:$0xff] }
 0x2f9   : > { %v1779_v5 = vrot.slane %v2864_v61, %v1778_v57 }
 0x2fb   : > { %1549 = vmatpush1.bf16.msra.mxu0 %v952_v63  ;;  %1713 = vmatpush1.bf16.msra.mxu1 %v954_v1  ;;  %v1033_v63 = vunpack.c.h.s8.bf16 %v561_v48  ;;  %v1035_v1 = vunpack.c.h.s8.bf16 %v563_v49 }
 0x2fc   : > { %1550 = vmatprep.subr.bf16.mxu0 %v961_v2  ;;  %1714 = vmatprep.subr.bf16.mxu1 %v963_v3  ;;  %v2868_v2 = vld [vmem:[%s1824_s13] sm:$0xff]  ;;  %v569_v3 = vld [vmem:[%s2513_s11 + $0x6e8] sm:$0xff] }
 0x2fd   : > { %v1830_v10 = vrot.slane %v2868_v2, %v1778_v57  ;;  %v1049_v35 = vunpack.c.h.s8.bf16 %v569_v3 }
 0x2ff   : > { %1551 = vmatpush1.bf16.msra.mxu0 %v960_v6  ;;  %1715 = vmatpush1.bf16.msra.mxu1 %v962_v7  ;;  %v1787_v6 = vrot.slane %v2864_v61, %v1786_v58  ;;  %v1783_v7 = vrot.slane %v2864_v61, %v1782_v30 }
 0x300   : > { %1552 = vmatprep.subr.bf16.mxu0 %v969_v12  ;;  %1716 = vmatprep.subr.bf16.mxu1 %v971_v8  ;;  %v1791_v12 = vrot.slane %v2864_v61, %v1790_v62  ;;  %v1032_v8 = vunpack.c.h.s8.bf16 %v560_v54 }
 0x303   : > { %1553 = vmatpush1.bf16.msra.mxu0 %v968_v11  ;;  %1717 = vmatpush1.bf16.msra.mxu1 %v970_v13  ;;  %v1838_v11 = vrot.slane %v2868_v2, %v1786_v58  ;;  %v1041_v13 = vunpack.c.l.s8.bf16 %v569_v3  ;;  %v593_v3 = vld [vmem:[%s2513_s11 + $0x7a8] sm:$0xff] }
 0x304   : > { %1554 = vmatprep.subr.bf16.mxu0 %v977_v14  ;;  %1718 = vmatprep.subr.bf16.mxu1 %v979_v20  ;;  %v1043_v14 = vunpack.c.l.s8.bf16 %v571_v4  ;;  %v568_v20 = vld [vmem:[%s2513_s11 + $0x6e0] sm:$0xff] }
 0x305   : > { %v1040_v29 = vunpack.c.l.s8.bf16 %v568_v20 }
 0x307   : > { %1555 = vmatpush1.bf16.msra.mxu0 %v976_v17  ;;  %1719 = vmatpush1.bf16.msra.mxu1 %v978_v18  ;;  %v1834_v18 = vrot.slane %v2868_v2, %v1782_v30 }
 0x308   : > { %1556 = vmatprep.subr.bf16.mxu0 %v985_v19  ;;  %1720 = vmatprep.subr.bf16.mxu1 %v987_v21  ;;  %v1842_v19 = vrot.slane %v2868_v2, %v1790_v62 }
 0x30b   : > { %1557 = vmatpush1.bf16.msra.mxu0 %v984_v24  ;;  %1721 = vmatpush1.bf16.msra.mxu1 %v986_v25 }
 0x30c   : > { %1567 = vmatprep.subr.bf16.mxu0 %v993_v26  ;;  %1731 = vmatprep.subr.bf16.mxu1 %v995_v27 }
 0x30e   : > { %1559 = vmatmul.mubr.bf16.vlgmr.msra.gmra.mrb[4].mxu0 %v2691_v56  ;;  %1723 = vmatmul.mubr.bf16.vlgmr.msra.gmra.mrb[4].mxu1 %v2691_v56  ;;  %v1008_v56 = vunpack.c.l.s8.bf16 %v552_v41  ;;  %v579_v41 = vld [vmem:[%s2513_s11 + $0x738] sm:$0xff] }
 0x30f   : > { %1568 = vmatpush1.bf16.msra.mxu0 %v992_v31  ;;  %1732 = vmatpush1.bf16.msra.mxu1 %v994_v32  ;;  %v1042_v31 = vunpack.c.l.s8.bf16 %v570_v15  ;;  %v603_v15 = vld [vmem:[%s2513_s11 + $0x7f8] sm:$0xff] }
 0x310   : > { %1569 = vmatprep.subr.bf16.mxu0 %v1001_v37  ;;  %1733 = vmatprep.subr.bf16.mxu1 %v1003_v33 }
 0x311   : > { %1599 = vmatprep.mubr.bf16.mxu0 %v2698_v0  ;;  %1763 = vmatprep.mubr.bf16.mxu1 %v2698_v0  ;;  %v1018_v0 = vunpack.c.h.s8.bf16 %v554_v42  ;;  %v1048_v42 = vunpack.c.h.s8.bf16 %v568_v20  ;;  %v601_v20 = vld [vmem:[%s2513_s11 + $0x7e8] sm:$0xff] }
 0x313   : > { %1570 = vmatpush1.bf16.msra.mxu0 %v1000_v36  ;;  %1734 = vmatpush1.bf16.msra.mxu1 %v1002_v38  ;;  %v1051_v36 = vunpack.c.h.s8.bf16 %v571_v4  ;;  %v595_v4 = vld [vmem:[%s2513_s11 + $0x7b8] sm:$0xff] }
 0x314   : > { %1571 = vmatprep.subr.bf16.mxu0 %v1009_v40  ;;  %1735 = vmatprep.subr.bf16.mxu1 %v1011_v45  ;;  %v577_v45 = vld [vmem:[%s2513_s11 + $0x728] sm:$0xff] }
 0x317   : > { %1572 = vmatpush1.bf16.msra.mxu0 %v1008_v56  ;;  %1736 = vmatpush1.bf16.msra.mxu1 %v1010_v44  ;;  %v1057_v56 = vunpack.c.l.s8.bf16 %v577_v45  ;;  %v1059_v44 = vunpack.c.l.s8.bf16 %v579_v41 }
 0x318   : > { %1573 = vmatprep.subr.bf16.mxu0 %v1017_v46  ;;  %1737 = vmatprep.subr.bf16.mxu1 %v1019_v47  ;;  %v576_v46 = vld [vmem:[%s2513_s11 + $0x720] sm:$0xff]  ;;  %v578_v47 = vld [vmem:[%s2513_s11 + $0x730] sm:$0xff] }
 0x319   : > { %v1056_v48 = vunpack.c.l.s8.bf16 %v576_v46  ;;  %v1058_v49 = vunpack.c.l.s8.bf16 %v578_v47  ;;  %v1064_v54 = vunpack.c.h.s8.bf16 %v576_v46  ;;  %v1066_v55 = vunpack.c.h.s8.bf16 %v578_v47 }
 0x31b   : > { %1574 = vmatpush1.bf16.msra.mxu0 %v1016_v51  ;;  %1738 = vmatpush1.bf16.msra.mxu1 %v1018_v0  ;;  %v1065_v51 = vunpack.c.h.s8.bf16 %v577_v45  ;;  %v1067_v0 = vunpack.c.h.s8.bf16 %v579_v41 }
 0x31c   : > { %1575 = vmatprep.subr.bf16.mxu0 %v1025_v52  ;;  %1739 = vmatprep.subr.bf16.mxu1 %v1027_v53  ;;  %v585_v52 = vld [vmem:[%s2513_s11 + $0x768] sm:$0xff]  ;;  %v587_v53 = vld [vmem:[%s2513_s11 + $0x778] sm:$0xff] }
 0x31d   : > { %v1073_v57 = vunpack.c.l.s8.bf16 %v585_v52  ;;  %v1075_v58 = vunpack.c.l.s8.bf16 %v587_v53 }
 0x31f   : > { %1576 = vmatpush1.bf16.msra.mxu0 %v1024_v59  ;;  %1740 = vmatpush1.bf16.msra.mxu1 %v1026_v60  ;;  %v584_v59 = vld [vmem:[%s2513_s11 + $0x760] sm:$0xff]  ;;  %v586_v60 = vld [vmem:[%s2513_s11 + $0x770] sm:$0xff] }
 0x320   : > { %1577 = vmatprep.subr.bf16.mxu0 %v1033_v63  ;;  %1741 = vmatprep.subr.bf16.mxu1 %v1035_v1  ;;  %v1072_v30 = vunpack.c.l.s8.bf16 %v584_v59  ;;  %v1074_v62 = vunpack.c.l.s8.bf16 %v586_v60  ;;  %v1081_v63 = vunpack.c.h.s8.bf16 %v585_v52  ;;  %v1083_v1 = vunpack.c.h.s8.bf16 %v587_v53 }
 0x321   : > { %v1273_v16 = vpop.f32.mrb[0].mxu0  ;;  %v1437_v17 = vpop.f32.mrb[0].mxu1 }
 0x322   : > { %v1816_v21 = vmul.f32 %v1779_v5, %v1273_v16  ;;  %v1818_v22 = vmul.f32 %v1787_v6, %v1437_v17  ;;  %v1275_v23 = vpop.f32.mrb[1].mxu0  ;;  %v1439_v24 = vpop.f32.mrb[1].mxu1  ;;  %v1080_v5 = vunpack.c.h.s8.bf16 %v584_v59  ;;  %v1082_v6 = vunpack.c.h.s8.bf16 %v586_v60 }
 0x323   : > { %v1817_v25 = vmul.f32 %v1783_v7, %v1275_v23  ;;  %v1819_v26 = vmul.f32 %v1791_v12, %v1439_v24  ;;  %v1277_v27 = vpop.f32.mrb[2].mxu0  ;;  %v1441_v28 = vpop.f32.mrb[2].mxu1  ;;  %1578 = vmatpush1.bf16.msra.mxu0 %v1032_v8  ;;  %1742 = vmatpush1.bf16.msra.mxu1 %v1034_v9  ;;  %v1089_v7 = vunpack.c.l.s8.bf16 %v593_v3  ;;  %v1091_v12 = vunpack.c.l.s8.bf16 %v595_v4  ;;  %v592_v8 = vld [vmem:[%s2513_s11 + $0x7a0] sm:$0xff]  ;;  %v594_v9 = vld [vmem:[%s2513_s11 + $0x7b0] sm:$0xff] }
 0x324   : > { %v2882_v32 = vadd.f32 %v1830_v10, %v1816_v21  ;;  %v2884_v37 = vadd.f32 %v1838_v11, %v1818_v22  ;;  %v1278_v33 = vpop.f32.mrb[3].mxu0  ;;  %v1442_v34 = vpop.f32.mrb[3].mxu1  ;;  %1579 = vmatprep.subr.bf16.mxu0 %v1041_v13  ;;  %1743 = vmatprep.subr.bf16.mxu1 %v1043_v14  ;;  %v1088_v10 = vunpack.c.l.s8.bf16 %v592_v8  ;;  %v1090_v11 = vunpack.c.l.s8.bf16 %v594_v9  ;;  %v600_v21 = vld [vmem:[%s2513_s11 + $0x7e0] sm:$0xff]  ;;  %v602_v22 = vld [vmem:[%s2513_s11 + $0x7f0] sm:$0xff] }
 0x325   : > { %v2886_v38 = vadd.f32 %v1834_v18, %v1817_v25  ;;  %v2888_v40 = vadd.f32 %v1842_v19, %v1819_v26  ;;  %v1097_v13 = vunpack.c.h.s8.bf16 %v593_v3  ;;  %v1099_v14 = vunpack.c.h.s8.bf16 %v595_v4 }
 0x326   : > { %v1096_v16 = vunpack.c.h.s8.bf16 %v592_v8  ;;  %v1098_v17 = vunpack.c.h.s8.bf16 %v594_v9  ;;  %v1105_v18 = vunpack.c.l.s8.bf16 %v601_v20  ;;  %v1107_v19 = vunpack.c.l.s8.bf16 %v603_v15 }
 0x327   : > { %1580 = vmatpush1.bf16.msra.mxu0 %v1040_v29  ;;  %1744 = vmatpush1.bf16.msra.mxu1 %v1042_v31  ;;  %v1104_v23 = vunpack.c.l.s8.bf16 %v600_v21  ;;  %v1106_v24 = vunpack.c.l.s8.bf16 %v602_v22  ;;  %v1113_v25 = vunpack.c.h.s8.bf16 %v601_v20  ;;  %v1115_v26 = vunpack.c.h.s8.bf16 %v603_v15 }
 0x328   : > { %1581 = vmatprep.subr.bf16.mxu0 %v1049_v35  ;;  %1745 = vmatprep.subr.bf16.mxu1 %v1051_v36  ;;  %v1112_v27 = vunpack.c.h.s8.bf16 %v600_v21  ;;  %v1114_v28 = vunpack.c.h.s8.bf16 %v602_v22  ;;  %v1794_v29 = vsub.s32 4, %v2858_v50  ;;  %v1802_v31 = vsub.s32 6, %v2858_v50 }
 0x329   : > { %v1798_v33 = vsub.s32 5, %v2858_v50  ;;  %v1806_v34 = vsub.s32 7, %v2858_v50  ;;  %v1879_v60 = vmax.f32 (!%p1997_p13), %v2882_v32, 0.0 }
 0x32a   : > { %v1795_v35 = vrot.slane %v2864_v61, %v1794_v29  ;;  %v1803_v36 = vrot.slane %v2864_v61, %v1802_v31 }
 0x32b   : > { %1582 = vmatpush1.bf16.msra.mxu0 %v1048_v42  ;;  %1746 = vmatpush1.bf16.msra.mxu1 %v1050_v43  ;;  %v1799_v45 = vrot.slane %v2864_v61, %v1798_v33  ;;  %v1807_v41 = vrot.slane %v2864_v61, %v1806_v34  ;;  %v1846_v42 = vrot.slane %v2868_v2, %v1794_v29 }
 0x32c   : > { %1583 = vmatprep.subr.bf16.mxu0 %v1057_v56  ;;  %1747 = vmatprep.subr.bf16.mxu1 %v1059_v44  ;;  %v1850_v44 = vrot.slane %v2868_v2, %v1798_v33  ;;  %v1858_v46 = vrot.slane %v2868_v2, %v1806_v34  ;;  %1887 = vst [vmem:[%s2995_s4] sm:$0xff] (!%p1997_p13), %v1879_v60 }
 0x32f   : > { %1584 = vmatpush1.bf16.msra.mxu0 %v1056_v48  ;;  %1748 = vmatpush1.bf16.msra.mxu1 %v1058_v49 }
 0x330   : > { %1585 = vmatprep.subr.bf16.mxu0 %v1065_v51  ;;  %1749 = vmatprep.subr.bf16.mxu1 %v1067_v0 }
 0x333   : > { %1586 = vmatpush1.bf16.msra.mxu0 %v1064_v54  ;;  %1750 = vmatpush1.bf16.msra.mxu1 %v1066_v55 }
 0x334   : > { %1587 = vmatprep.subr.bf16.mxu0 %v1073_v57  ;;  %1751 = vmatprep.subr.bf16.mxu1 %v1075_v58 }
 0x337   : > { %1588 = vmatpush1.bf16.msra.mxu0 %v1072_v30  ;;  %1752 = vmatpush1.bf16.msra.mxu1 %v1074_v62  ;;  %v1881_v30 = vmax.f32 (!%p1997_p13), %v2884_v37, 0.0  ;;  %v1882_v62 = vmax.f32 (!%p1997_p13), %v2888_v40, 0.0 }
 0x338   : > { %1589 = vmatprep.subr.bf16.mxu0 %v1081_v63  ;;  %1753 = vmatprep.subr.bf16.mxu1 %v1083_v1 }
 0x339   : > { %1889 = vst [vmem:[%s2995_s4 + $0x10] sm:$0xff] (!%p1997_p13), %v1881_v30  ;;  %1890 = vst [vmem:[%s2995_s4 + $0x18] sm:$0xff] (!%p1997_p13), %v1882_v62 }
 0x33b   : > { %1590 = vmatpush1.bf16.msra.mxu0 %v1080_v5  ;;  %1754 = vmatpush1.bf16.msra.mxu1 %v1082_v6 }
 0x33c   : > { %1591 = vmatprep.subr.bf16.mxu0 %v1089_v7  ;;  %1755 = vmatprep.subr.bf16.mxu1 %v1091_v12 }
 0x33f   : > { %1592 = vmatpush1.bf16.msra.mxu0 %v1088_v10  ;;  %1756 = vmatpush1.bf16.msra.mxu1 %v1090_v11 }
 0x340   : > { %1593 = vmatprep.subr.bf16.mxu0 %v1097_v13  ;;  %1757 = vmatprep.subr.bf16.mxu1 %v1099_v14 }
 0x343   : > { %1594 = vmatpush1.bf16.msra.mxu0 %v1096_v16  ;;  %1758 = vmatpush1.bf16.msra.mxu1 %v1098_v17 }
 0x344   : > { %1595 = vmatprep.subr.bf16.mxu0 %v1105_v18  ;;  %1759 = vmatprep.subr.bf16.mxu1 %v1107_v19 }
 0x347   : > { %1596 = vmatpush1.bf16.msra.mxu0 %v1104_v23  ;;  %1760 = vmatpush1.bf16.msra.mxu1 %v1106_v24 }
 0x348   : > { %1597 = vmatprep.subr.bf16.mxu0 %v1113_v25  ;;  %1761 = vmatprep.subr.bf16.mxu1 %v1115_v26 }
 0x34b   : > { %1598 = vmatpush1.bf16.msra.mxu0 %v1112_v27  ;;  %1762 = vmatpush1.bf16.msra.mxu1 %v1114_v28 }
 0x34e   : > { %1600 = vmatmul.mubr.bf16.vlgmr.msra.gmra.mrb[4].mxu0 %v2737_v39  ;;  %1764 = vmatmul.mubr.bf16.vlgmr.msra.gmra.mrb[4].mxu1 %v2737_v39  ;;  %v1854_v39 = vrot.slane %v2868_v2, %v1802_v31  ;;  %v1880_v2 = vmax.f32 (!%p1997_p13), %v2886_v38, 0.0 }
 0x350   : > { %1888 = vst [vmem:[%s2995_s4 + $0x8] sm:$0xff] (!%p1997_p13), %v1880_v2 }
 0x41f   : > { %1878 = sbr.rel (%p1997_p13) target bundleno = 1066 (0x42a), region = 60 }
 0x421   : > { %v1601_v43 = vpop.f32.mrb[4].mxu0  ;;  %v1765_v56 = vpop.f32.mrb[4].mxu1 }
 0x422   : > { %v1820_v47 = vmul.f32 %v1795_v35, %v1601_v43  ;;  %v1822_v50 = vmul.f32 %v1803_v36, %v1765_v56  ;;  %v1603_v48 = vpop.f32.mrb[5].mxu0  ;;  %v1767_v49 = vpop.f32.mrb[5].mxu1 }
 0x423   : > { %v1821_v51 = vmul.f32 %v1799_v45, %v1603_v48  ;;  %v1823_v0 = vmul.f32 %v1807_v41, %v1767_v49  ;;  %v1605_v52 = vpop.f32.mrb[6].mxu0  ;;  %v1769_v53 = vpop.f32.mrb[6].mxu1 }
 0x424   : > { %v1871_v54 = vadd.f32 %v1846_v42, %v1820_v47  ;;  %v1873_v61 = vadd.f32 %v1854_v39, %v1822_v50  ;;  %v1606_v55 = vpop.f32.mrb[7].mxu0  ;;  %v1770_v57 = vpop.f32.mrb[7].mxu1 }
 0x425   : > { %v1872_v58 = vadd.f32 %v1850_v44, %v1821_v51  ;;  %v1874_v59 = vadd.f32 %v1858_v46, %v1823_v0 }
 0x426   : > { %v1883_v63 = vmax.f32 %v1871_v54, 0.0  ;;  %v1885_v3 = vmax.f32 %v1873_v61, 0.0 }
 0x427   : > { %v1884_v1 = vmax.f32 %v1872_v58, 0.0  ;;  %v1886_v4 = vmax.f32 %v1874_v59, 0.0 }
 0x428   : > { %1891 = vst [vmem:[%s2995_s4 + $0x20] sm:$0xff] %v1883_v63  ;;  %1893 = vst [vmem:[%s2995_s4 + $0x30] sm:$0xff] %v1885_v3 }
 0x429   : > { %1892 = vst [vmem:[%s2995_s4 + $0x28] sm:$0xff] %v1884_v1  ;;  %1894 = vst [vmem:[%s2995_s4 + $0x38] sm:$0xff] %v1886_v4 }
 0x42a PF: > { %p1998_p12 = scmp.ne.s32.totalorder %s2353_s19, 6 }
 0x42b   : > { %1899 = vst [vmem:[%s2995_s4] sm:$0xff] (!%p1998_p12), %v2882_v32  ;;  %1900 = vst [vmem:[%s2995_s4 + $0x8] sm:$0xff] (!%p1998_p12), %v2886_v38 }
 0x42c   : > { %1898 = sbr.rel (%p1998_p12) target bundleno = 1075 (0x433), region = 64  ;;  %1901 = vst [vmem:[%s2995_s4 + $0x10] sm:$0xff] (!%p1998_p12), %v2884_v37  ;;  %1902 = vst [vmem:[%s2995_s4 + $0x18] sm:$0xff] (!%p1998_p12), %v2888_v40 }
 0x42d   : > { %1903 = vst [vmem:[%s2995_s4 + $0x20] sm:$0xff] (!%p1998_p12), %v1871_v54  ;;  %1904 = vst [vmem:[%s2995_s4 + $0x28] sm:$0xff] (!%p1998_p12), %v1872_v58 }
 0x42e   : > { %1905 = vst [vmem:[%s2995_s4 + $0x30] sm:$0xff] (!%p1998_p12), %v1873_v61  ;;  %1906 = vst [vmem:[%s2995_s4 + $0x38] sm:$0xff] (!%p1998_p12), %v1874_v59 }
 0x433 PF: > { %s3017_s26 = sld [smem:[#allocation13_spill]]  ;;  %p16_p8 = scmp.ge.s32.totalorder %s2356_s20, 9  }
 0x434   : > { %s3018_s15 = smov %s2291_s16  ;;  %s3019_s16 = smov %s2295_s17 }
 0x435   : > { %s3021_s18 = smov %s2356_s20  ;;  %18 = sbr.rel (!%p16_p8) target bundleno = 5 (0x5), region = 99 }
 0x439   : > { %s3020_s17 = smov %s3017_s26 }
 0x43c   :  { %1918 = vsyncpa [#allocation3], 1 }
 0x43d   :  { %1920 = vsyncpa [#allocation3 + $0x1], 1 }
 0x43e   :  { %1921 = vsyncpa [#allocation5], 1 }
 0x43f   :  { %1923 = vsyncpa [#allocation5 + $0x1], 1 }
 0x440   :  { %1924 = vsyncpa [#allocation8], 1 }

</bundles_post_ra>
